<compile_context>
chip_gen: v6e
topology: v6e:2x2x1
jax: 0.10.0
libtpu: 0.0.40
codegen_flags: <defaults>
</compile_context>

<pallas_src>
import jax
import jax.numpy as jnp
from jax.experimental import pallas as pl
from jax.experimental.pallas import tpu as pltpu


def _round_up(x, m):
    return ((x + m - 1) // m) * m


def mlp_prop_kernel(xs_ref, batch_ref, w1_ref, b1_ref, w2_ref, b2_ref, out_ref):
    # out_ref: [1, G_pad, H_pad] f32 partial pooled sum for this core-split.
    # Same output block across the "arbitrary" node-tile axis -> stays resident in
    # VMEM and acts as the accumulator; written back to HBM once per split.
    @pl.when(pl.program_id(1) == 0)
    def _init():
        out_ref[...] = jnp.zeros_like(out_ref)

    # out_head, transposed layout: features on sublanes, nodes (TN) on lanes.
    # hT = ReLU(W1rep^T @ xs_t + b1)                      [H_pad, TN]
    h = jnp.dot(w1_ref[...], xs_ref[...], preferred_element_type=jnp.float32)
    h = jnp.maximum(h + b1_ref[...], 0.0)
    # h2T = W2^T @ hT + b2                                [H_pad, TN]
    h2 = jnp.dot(w2_ref[...], h.astype(jnp.bfloat16),
                 preferred_element_type=jnp.float32) + b2_ref[...]

    # AddPool one-hot matrix (subgraph mask + node padding already folded into the
    # batch ids upstream as -1): P[g, n] = (batch[n] == g)          [G_pad, TN]
    g_pad = out_ref.shape[1]
    tn = xs_ref.shape[1]
    gids = jax.lax.broadcasted_iota(jnp.int32, (g_pad, tn), 0)
    p = (gids == batch_ref[...]).astype(jnp.float32)

    # Partial pooled sum [G_pad, H_pad] += P @ h2T^T (contract the node/lane axis of
    # both). f32 operands so the segment sum is not bf16-rounded; it is a tiny matmul.
    contrib = jax.lax.dot_general(
        p, h2, dimension_numbers=(((1,), (1,)), ((), ())),
        preferred_element_type=jnp.float32)
    out_ref[...] += contrib[None]


def mlp_prop_forward(xs_stacked, batch, nodes_in_subG, params, num_graphs, *,
                     tn=4096, num_splits=2):
    """xs_stacked: [L, N, Din] f32; batch: [N] int; nodes_in_subG: [N] bool -> [G, O] f32."""
    assert tn % 128 == 0, "node tile must be a multiple of 128 (lane width)"
    assert num_splits >= 1
    L, N, Din = xs_stacked.shape
    w1, b1, w2, b2, w3, b3 = params
    H, O, G = w1.shape[1], w3.shape[1], num_graphs

    LD = L * Din
    H_pad = _round_up(H, 16)            # H sits on sublanes -> no 128 pad needed
    G_pad = _round_up(G, 8)
    N_pad = _round_up(N, num_splits * tn)
    num_tiles = N_pad // tn
    tiles_per_split = num_tiles // num_splits

    # ---- layout plumbing (would live upstream in a real pipeline) -----------
    # xs: [L, N, Din] -> [L*Din, N_pad] bf16, node axis on lanes, padded nodes zero.
    xs_t = jnp.transpose(xs_stacked, (0, 2, 1)).reshape(LD, N)
    xs_t = jnp.pad(xs_t, ((0, 0), (0, N_pad - N))).astype(jnp.bfloat16)
    # Fold the subgraph mask into the batch ids (masked/padded nodes -> -1).
    batch_m = jnp.where(nodes_in_subG, batch.astype(jnp.int32), -1)
    batch_row = jnp.pad(batch_m, (0, N_pad - N),
                        constant_values=-1).reshape(1, N_pad)

    # Fold the residual layer-sum into W1 (tile rows L times); transpose weights to
    # [out, in]; pad H to H_pad; bf16 matmul operands, f32 biases.
    w1t = jnp.pad(jnp.tile(w1, (L, 1)).T, ((0, H_pad - H), (0, 0))).astype(jnp.bfloat16)
    w2t = jnp.pad(w2.T, ((0, H_pad - H), (0, H_pad - H))).astype(jnp.bfloat16)
    b1c = jnp.pad(b1, (0, H_pad - H)).astype(jnp.float32).reshape(H_pad, 1)
    b2c = jnp.pad(b2, (0, H_pad - H)).astype(jnp.float32).reshape(H_pad, 1)

    # Explicit VMEM budget only needed once tn grows large (v7x: 64 MiB / 32 scoped).
    vmem_limit = None
    if tn >= 8192:
        est = (2 * LD * tn * 2          # double-buffered xs (bf16)
               + 2 * tn * 4             # double-buffered batch ids
               + 4 * H_pad * tn * 4     # h, h2, bf16 casts (upper bound)
               + G_pad * tn * 4         # pool matrix
               + (1 << 20))             # resident weights + headroom
        vmem_limit = min(2 * est, 96 * 1024 * 1024)

    partials = pl.pallas_call(
        mlp_prop_kernel,
        out_shape=jax.ShapeDtypeStruct((num_splits, G_pad, H_pad), jnp.float32),
        grid_spec=pltpu.PrefetchScalarGridSpec(
            num_scalar_prefetch=0,
            grid=(num_splits, tiles_per_split),
            in_specs=[
                pl.BlockSpec((LD, tn),                       # xs tile (pipelined)
                             lambda c, t: (0, c * tiles_per_split + t)),
                pl.BlockSpec((1, tn),                        # masked batch ids
                             lambda c, t: (0, c * tiles_per_split + t)),
                pl.BlockSpec((H_pad, LD), lambda c, t: (0, 0)),     # W1rep^T (resident)
                pl.BlockSpec((H_pad, 1), lambda c, t: (0, 0)),      # b1
                pl.BlockSpec((H_pad, H_pad), lambda c, t: (0, 0)),  # W2^T    (resident)
                pl.BlockSpec((H_pad, 1), lambda c, t: (0, 0)),      # b2
            ],
            out_specs=pl.BlockSpec((1, G_pad, H_pad), lambda c, t: (c, 0, 0)),
        ),
        compiler_params=pltpu.CompilerParams(
            dimension_semantics=("parallel", "arbitrary"),  # split axis parallel (v7x),
            vmem_limit_bytes=vmem_limit),                   # node axis reduces into out
    )(xs_t, batch_row, w1t, b1c, w2t, b2c)

    # Tiny cross-split reduce + pred_head (G x H @ H x O) in plain XLA.
    pooled = jnp.sum(partials, axis=0)[:G, :H]          # [G, H]
    return pooled @ w3 + b3                              # [G, O]


def reference_forward(xs_stacked, batch, nodes_in_subG, params, num_graphs):
    w1, b1, w2, b2, w3, b3 = params
    xss = jnp.sum(xs_stacked, axis=0)
    h = jnp.maximum(xss @ w1 + b1, 0.0)
    h = h @ w2 + b2
    mask = nodes_in_subG.astype(jnp.float32)[:, None]
    seg = jax.nn.one_hot(batch, num_graphs, dtype=jnp.float32)       # [N, G]
    sub = (seg * mask).T @ h                                         # [G, H]
    return sub @ w3 + b3


if __name__ == "__main__":
    key = jax.random.PRNGKey(0)

    # Small model dims consistent with the module; N chosen so the performant
    # defaults (tn=4096, num_splits=2) still exercise multiple node tiles per split,
    # both splits, padded nodes, masked nodes and G not a multiple of 8.
    L, N, Din, H, O, G = 3, 12000, 4, 32, 8, 6

    keys = jax.random.split(key, 9)
    xs_stacked = jax.random.normal(keys[0], (L, N, Din), dtype=jnp.float32)
    batch = jax.random.randint(keys[1], (N,), 0, G, dtype=jnp.int32)
    nodes_in_subG = jax.random.bernoulli(keys[2], 0.7, (N,))

    w1 = jax.random.normal(keys[3], (Din, H), dtype=jnp.float32) * 0.1
    b1 = jax.random.normal(keys[4], (H,), dtype=jnp.float32) * 0.1
    w2 = jax.random.normal(keys[5], (H, H), dtype=jnp.float32) * 0.1
    b2 = jax.random.normal(keys[6], (H,), dtype=jnp.float32) * 0.1
    w3 = jax.random.normal(keys[7], (H, O), dtype=jnp.float32) * 0.1
    b3 = jax.random.normal(keys[8], (O,), dtype=jnp.float32) * 0.1
    params = (w1, b1, w2, b2, w3, b3)

    out = mlp_prop_forward(xs_stacked, batch, nodes_in_subG, params, G)
    out = jax.block_until_ready(out)

    ref = reference_forward(xs_stacked, batch, nodes_in_subG, params, G)
    assert out.shape == (G, O)
    # bf16 operands on the W1/W2 matmuls (f32 accumulation, f32 pooling) -> small
    # relative error even with ~2000 pooled nodes per graph.
    max_err = float(jnp.max(jnp.abs(out - ref)))
    scale = float(jnp.max(jnp.abs(ref)))
    assert max_err <= 2e-2 * scale + 1e-1, f"mismatch: max abs err={max_err}, scale={scale}"
    print("KERNEL_OK")
</pallas_src>

<mosaic_0001>
module attributes {stable_mosaic.version = 11 : i64} {
  func.func @mlp_prop_kernel(%arg0: i32, %arg1: i32, %arg2: memref<12x4096xbf16, #tpu.memory_space<vmem>>, %arg3: memref<1x4096xi32, #tpu.memory_space<vmem>>, %arg4: memref<32x12xbf16, #tpu.memory_space<vmem>>, %arg5: memref<32x1xf32, #tpu.memory_space<vmem>>, %arg6: memref<32x32xbf16, #tpu.memory_space<vmem>>, %arg7: memref<32x1xf32, #tpu.memory_space<vmem>>, %arg8: memref<1x8x32xf32, #tpu.memory_space<vmem>>) attributes {dimension_semantics = [#tpu.dimension_semantics<parallel>, #tpu.dimension_semantics<arbitrary>], iteration_bounds = array<i64: 2, 2>, scalar_prefetch = 0 : i64, scratch_operands = 0 : i64, tpu.core_type = #tpu.core_type<tc>, window_params = [{transform_indices = @transform_0, window_bounds = array<i64: 12, 4096>}, {transform_indices = @transform_1, window_bounds = array<i64: 1, 4096>}, {pipeline_mode = #tpu.pipeline_mode<synchronous>, transform_indices = @transform_2, window_bounds = array<i64: 32, 12>}, {pipeline_mode = #tpu.pipeline_mode<synchronous>, transform_indices = @transform_3, window_bounds = array<i64: 32, 1>}, {pipeline_mode = #tpu.pipeline_mode<synchronous>, transform_indices = @transform_4, window_bounds = array<i64: 32, 32>}, {pipeline_mode = #tpu.pipeline_mode<synchronous>, transform_indices = @transform_5, window_bounds = array<i64: 32, 1>}, {transform_indices = @transform_6, window_bounds = array<i64: 1, 8, 32>}]} {
    %c0_i32 = arith.constant 0 : i32
    %0 = arith.cmpi eq, %arg1, %c0_i32 : i32
    %1 = arith.extui %0 : i1 to i32
    %c0_i32_0 = arith.constant 0 : i32
    %2 = arith.cmpi ne, %1, %c0_i32_0 : i32
    scf.if %2 {
      %cst_21 = arith.constant 0.000000e+00 : f32
      %28 = vector.broadcast %cst_21 : f32 to vector<1x8x32xf32>
      %c0_22 = arith.constant 0 : index
      %c0_23 = arith.constant 0 : index
      %c0_24 = arith.constant 0 : index
      %29 = vector.load %arg8[%c0_22, %c0_23, %c0_24] : memref<1x8x32xf32, #tpu.memory_space<vmem>>, vector<1x8x32xf32>
      tpu.vector_store %arg8[%c0_22, %c0_23, %c0_24], %28 {strides = array<i32>} : memref<1x8x32xf32, #tpu.memory_space<vmem>>, vector<1x8x32xf32>,
    } else {
    }
    %c0 = arith.constant 0 : index
    %c0_1 = arith.constant 0 : index
    %3 = vector.load %arg4[%c0, %c0_1] : memref<32x12xbf16, #tpu.memory_space<vmem>>, vector<32x12xbf16>
    %c0_2 = arith.constant 0 : index
    %c0_3 = arith.constant 0 : index
    %4 = vector.load %arg2[%c0_2, %c0_3] : memref<12x4096xbf16, #tpu.memory_space<vmem>>, vector<12x4096xbf16>
    %cst = arith.constant dense<0.000000e+00> : vector<32x4096xf32>
    %5 = tpu.matmul %3, %4, %cst {dimension_numbers = #tpu.dot_dimension_numbers<[1], [0], [0], [1], [0, 0, 1, 1], [], []>} : vector<32x12xbf16>, vector<12x4096xbf16>, vector<32x4096xf32> -> vector<32x4096xf32>
    %c0_4 = arith.constant 0 : index
    %c0_5 = arith.constant 0 : index
    %6 = vector.load %arg5[%c0_4, %c0_5] : memref<32x1xf32, #tpu.memory_space<vmem>>, vector<32x1xf32>
    %7 = vector.broadcast %6 : vector<32x1xf32> to vector<32x4096xf32>
    %8 = arith.addf %5, %7 : vector<32x4096xf32>
    %cst_6 = arith.constant 0.000000e+00 : f32
    %9 = vector.broadcast %cst_6 : f32 to vector<32x4096xf32>
    %10 = arith.maximumf %8, %9 : vector<32x4096xf32>
    %c0_7 = arith.constant 0 : index
    %c0_8 = arith.constant 0 : index
    %11 = vector.load %arg6[%c0_7, %c0_8] : memref<32x32xbf16, #tpu.memory_space<vmem>>, vector<32x32xbf16>
    %12 = arith.truncf %10 : vector<32x4096xf32> to vector<32x4096xbf16>
    %cst_9 = arith.constant dense<0.000000e+00> : vector<32x4096xf32>
    %13 = tpu.matmul %11, %12, %cst_9 {dimension_numbers = #tpu.dot_dimension_numbers<[1], [0], [0], [1], [0, 0, 1, 1], [], []>} : vector<32x32xbf16>, vector<32x4096xbf16>, vector<32x4096xf32> -> vector<32x4096xf32>
    %c0_10 = arith.constant 0 : index
    %c0_11 = arith.constant 0 : index
    %14 = vector.load %arg7[%c0_10, %c0_11] : memref<32x1xf32, #tpu.memory_space<vmem>>, vector<32x1xf32>
    %15 = vector.broadcast %14 : vector<32x1xf32> to vector<32x4096xf32>
    %16 = arith.addf %13, %15 : vector<32x4096xf32>
    %17 = tpu.iota {dimensions = array<i32: 0>} : vector<8x4096xi32>
    %c0_12 = arith.constant 0 : index
    %c0_13 = arith.constant 0 : index
    %18 = vector.load %arg3[%c0_12, %c0_13] : memref<1x4096xi32, #tpu.memory_space<vmem>>, vector<1x4096xi32>
    %19 = vector.broadcast %18 : vector<1x4096xi32> to vector<8x4096xi32>
    %20 = arith.cmpi eq, %17, %19 : vector<8x4096xi32>
    %21 = arith.extui %20 : vector<8x4096xi1> to vector<8x4096xi32>
    %22 = arith.sitofp %21 : vector<8x4096xi32> to vector<8x4096xf32>
    %cst_14 = arith.constant dense<0.000000e+00> : vector<8x32xf32>
    %23 = tpu.matmul %22, %16, %cst_14 {dimension_numbers = #tpu.dot_dimension_numbers<[1], [1], [0], [0], [0, 0, 1, 0], [], []>} : vector<8x4096xf32>, vector<32x4096xf32>, vector<8x32xf32> -> vector<8x32xf32>
    %c0_15 = arith.constant 0 : index
    %c0_16 = arith.constant 0 : index
    %c0_17 = arith.constant 0 : index
    %24 = vector.load %arg8[%c0_15, %c0_16, %c0_17] : memref<1x8x32xf32, #tpu.memory_space<vmem>>, vector<1x8x32xf32>
    %25 = vector.shape_cast %23 : vector<8x32xf32> to vector<1x8x32xf32>
    %26 = arith.addf %24, %25 : vector<1x8x32xf32>
    %c0_18 = arith.constant 0 : index
    %c0_19 = arith.constant 0 : index
    %c0_20 = arith.constant 0 : index
    %27 = vector.load %arg8[%c0_18, %c0_19, %c0_20] : memref<1x8x32xf32, #tpu.memory_space<vmem>>, vector<1x8x32xf32>
    tpu.vector_store %arg8[%c0_18, %c0_19, %c0_20], %26 {strides = array<i32>} : memref<1x8x32xf32, #tpu.memory_space<vmem>>, vector<1x8x32xf32>,
    return
  }
  func.func @transform_0(%arg0: i32, %arg1: i32) -> (i32, i32) {
    %c2_i32 = arith.constant 2 : i32
    %0 = arith.muli %arg0, %c2_i32 : i32
    %1 = arith.addi %0, %arg1 : i32
    %c0_i32 = arith.constant 0 : i32
    %c0_i32_0 = arith.constant 0 : i32
    return %c0_i32, %1 : i32, i32
  }
  func.func @transform_1(%arg0: i32, %arg1: i32) -> (i32, i32) {
    %c2_i32 = arith.constant 2 : i32
    %0 = arith.muli %arg0, %c2_i32 : i32
    %1 = arith.addi %0, %arg1 : i32
    %c0_i32 = arith.constant 0 : i32
    %c0_i32_0 = arith.constant 0 : i32
    return %c0_i32, %1 : i32, i32
  }
  func.func @transform_2(%arg0: i32, %arg1: i32) -> (i32, i32) {
    %c0_i32 = arith.constant 0 : i32
    %c0_i32_0 = arith.constant 0 : i32
    %c0_i32_1 = arith.constant 0 : i32
    return %c0_i32, %c0_i32_0 : i32, i32
  }
  func.func @transform_3(%arg0: i32, %arg1: i32) -> (i32, i32) {
    %c0_i32 = arith.constant 0 : i32
    %c0_i32_0 = arith.constant 0 : i32
    %c0_i32_1 = arith.constant 0 : i32
    return %c0_i32, %c0_i32_0 : i32, i32
  }
  func.func @transform_4(%arg0: i32, %arg1: i32) -> (i32, i32) {
    %c0_i32 = arith.constant 0 : i32
    %c0_i32_0 = arith.constant 0 : i32
    %c0_i32_1 = arith.constant 0 : i32
    return %c0_i32, %c0_i32_0 : i32, i32
  }
  func.func @transform_5(%arg0: i32, %arg1: i32) -> (i32, i32) {
    %c0_i32 = arith.constant 0 : i32
    %c0_i32_0 = arith.constant 0 : i32
    %c0_i32_1 = arith.constant 0 : i32
    return %c0_i32, %c0_i32_0 : i32, i32
  }
  func.func @transform_6(%arg0: i32, %arg1: i32) -> (i32, i32, i32) {
    %c0_i32 = arith.constant 0 : i32
    %c0_i32_0 = arith.constant 0 : i32
    %c0_i32_1 = arith.constant 0 : i32
    return %arg0, %c0_i32, %c0_i32_0 : i32, i32, i32
  }
}

</mosaic_0001>

<bundles_post_ra>
// kernel: tpu_custom_call.1
= control target key start
LH: loop header
LB: loop body
LE: loop exit
PB: predicated region body
PF: predicated region fallthrough
CT: control target
= control target key end

     0   :  { %s5752_s0 = inlined_call_operand.hbm [shape: bf16[12,16384], index: 0, kind: input, shape index: {}]   ;;  %s5753_s1 = inlined_call_operand.hbm [shape: s32[1,16384], index: 1, kind: input, shape index: {}]   ;;  %s5754_s2 = inlined_call_operand.vmem [shape: bf16[32,12], index: 2, kind: input, shape index: {}]   ;;  %s5755_s3 = inlined_call_operand.vmem [shape: f32[32,1], index: 3, kind: input, shape index: {}]   ;;  %s5756_s4 = inlined_call_operand.vmem [shape: bf16[32,32], index: 4, kind: input, shape index: {}]   ;;  %s5757_s5 = inlined_call_operand.vmem [shape: f32[32,1], index: 5, kind: input, shape index: {}]   ;;  %s5758_s6 = inlined_call_operand.hbm [shape: f32[2,8,32], index: 6, kind: output, shape index: {}]  }
   0x1   :  { %5768 = sst [smem:[#allocation21_spill]] %s5752_s0 }
   0x2   :  { %5769 = sst [smem:[#allocation22_spill]] %s5758_s6 }
   0x3   :  { %11 = vsyncpa [#allocation3], 0 }
   0x4   :  { %13 = vsyncpa [#allocation3 + $0x1], 0 }
   0x5   :  { %14 = vsyncpa [#allocation6], 0 }
   0x6   :  { %16 = vsyncpa [#allocation6 + $0x1], 0 }
   0x7   :  { %17 = vsyncpa [#allocation4], 0 }
   0x8   :  { %19 = vsyncpa [#allocation4 + $0x1], 0  ;;  %s4607_s21 = smov 0   ;;  %s4609_s22 = smov 0  }
   0x9   :  { %s4611_s23 = smov 0   ;;  %s4613_s24 = smov 0  }
   0xa   :  { %s4615_s25 = smov 0   ;;  %s4617_s26 = smov 0  }
   0xb   :  { %s4619_s27 = smov 0   ;;  %s4621_s28 = smov 0  }
   0xc   :  { %s4623_s29 = smov 0   ;;  %s4625_s30 = smov 0  }
   0xd   :  { %s4627_s7 = smov 0  }
   0xe LB: > { %5770 = sst [smem:[#allocation11_spill]] %s4521_s21  ;;  %s4055_s8 = sadd.s32 4294967295, %s4561_s7   ;;  %s4561_s7 = sphi %s4627_s7, %s25_s7   ;;  %s4557_s30 = sphi %s4625_s30, %s5800_s30   ;;  %s4553_s29 = sphi %s4623_s29, %s5805_s29   ;;  %s4549_s28 = sphi %s4621_s28, %s5798_s28   ;;  %s4545_s27 = sphi %s4619_s27, %s5797_s27   ;;  %s4541_s26 = sphi %s4617_s26, %s5796_s26   ;;  %s4537_s25 = sphi %s4615_s25, %s5804_s25   ;;  %s4533_s24 = sphi %s4613_s24, %s5803_s24   ;;  %s4529_s23 = sphi %s4611_s23, %s5794_s23   ;;  %s4525_s22 = sphi %s4609_s22, %s5802_s22   ;;  %s4521_s21 = sphi %s4607_s21, %s5801_s21  }
   0xf   : > { %5771 = sst [smem:[#allocation12_spill]] %s4529_s23  ;;  %s34_s10 = sadd.s32 1, %s4553_s29 }
  0x10   : > { %5772 = sst [smem:[#allocation13_spill]] %s4541_s26  ;;  %s37_s11 = sadd.s32 1, %s4557_s30 }
  0x11   : > { %5773 = sst [smem:[#allocation14_spill]] %s4553_s29  ;;  %p35_p0 = scmp.ge.s32.totalorder %s34_s10, 2 }
  0x12   : > { %5774 = sst [smem:[#allocation15_spill]] %s4557_s30  ;;  %s4057_s12 = sshll.u32 %s4557_s30, 1 }
  0x13   : > { %s4666_s13 = sadd.s32 %s4553_s29, %s4057_s12  ;;  %s48_s14 = sadd.s32 1, %s4541_s26 }
  0x14   : > { %s5807_s10 = smov (%p35_p0, %s34_s10), 0  ;;  %s5809_s11 = smov (!%p35_p0, %s37_s11), %s4557_s30 }
  0x15   : > { %5775 = sst [smem:[#allocation16_spill]] %s5807_s10  ;;  %p55_p1 = scmp.ne.s32.totalorder %s4541_s26, %s4537_s25 }
  0x16   : > { %p56_p2 = scmp.eq.s32.totalorder %s4561_s7, 0  ;;  %p39_p3 = scmp.ge.s32.totalorder %s5809_s11, 2 }
  0x17   : > { %p61_p4 = scmp.ne.s32.totalorder %s4537_s25, %s4533_s24  ;;  %p62_p6 = scmp.eq.s32.totalorder %s4055_s8, 0 }
  0x18   : > { %p4676_p5 = por %p56_p2, %p55_p1  ;;  %s5811_s11 = smov (%p39_p3, %s5809_s11), 0 }
  0x19   : > { %5777 = sst [smem:[#allocation17_spill]] %s5811_s11  ;;  %p4682_p7 = por %p62_p6, %p61_p4 }
  0x1a   : > { %s188_s17 = sadd.s32 1, %s4529_s23  ;;  %s4058_s18 = sshll.u32 %s5811_s11, 1 }
  0x1b   : > { %s185_s19 = ssub.s32 %s4557_s30, %s5811_s11  ;;  %s44_s20 = sadd.s32 %s4058_s18, %s5807_s10 }
  0x1c   : > { %p186_p8 = scmp.eq.s32.totalorder %s185_s19, 0  ;;  %s45_s24 = ssub.s32 %s4666_s13, %s44_s20 }
  0x1d   : > { %p198_p9 = scmp.ne.s32.totalorder %s4529_s23, %s4525_s22  ;;  %p46_p10 = scmp.eq.s32.totalorder %s45_s24, 0 }
  0x1e   : > { %p199_p11 = scmp.eq.s32.totalorder %s4055_s8, 3  ;;  %p204_p13 = scmp.ne.s32.totalorder %s4525_s22, %s4521_s21 }
  0x1f   : > { %s4695_s12 = scalar_select %p186_p8, %s4529_s23, %s188_s17  }
  0x20   : > { %s4698_s9 = scalar_select %p46_p10, %s4541_s26, %s48_s14  }
  0x21   : > { %5779 = sst [smem:[#allocation18_spill]] %s4695_s12  ;;  %p4700_p12 = por %p199_p11, %p198_p9 }
  0x22   : > { %5780 = sst [smem:[#allocation19_spill]] %s4698_s9  ;;  %s5782_s6 = sadd.s32 4294967294, %s4561_s7  }
  0x23   : > { %p205_p0 = scmp.eq.s32.totalorder %s5782_s6, 3  ;;  %p4279_p1 = scmp.lt.s32.totalorder %s4561_s7, 4 }
  0x24   : > { %s4710_s18 = sand.u32 1, %s4541_s26   ;;  %s4260_s17 = sshll.u32 %s4666_s13, 11 }
  0x25   : > { %p4712_p2 = por %p205_p0, %p204_p13  ;;  %s4063_s8 = sshll.u32 %s4710_s18, 8 }
  0x26   : > { %s5785_s0 = sld [smem:[#allocation21_spill]]  ;;  %s241_s11 = scalar_lea.vmem [#allocation2], %s4063_s8 }
  0x27   : > { %s5783_s19 = scalar_select %p4712_p2, 1, 0 }
  0x28   : > { %s250_s10 = sshll.u32 %s241_s11, 4  ;;  %p4723_p3 = pnand %p4279_p1, %p4676_p5  ;;  %s251_s10 = int_to_ptr.vmem [resolvable:$true] %s250_s10 }
  0x29   : > { %5784 = sst [smem:[#allocation20_spill]] %s5783_s19  ;;  %p4071_p4 = scmp.ge.s32.totalorder %s4561_s7, 1 }
  0x2a   : > { %s238_s30 = scalar_lea.sflag [#allocation3], %s4710_s18  ;;  %p4383_p6 = pneg %p4723_p3 }
  0x2b   : > { %s4394_s9 = scalar_lea.vmem %s251_s10, 4096  ;;  %s4563_s8 = smov [#allocation2]  }
  0x2c   : > { %s249_s24 = scalar_lea.hbm %s5785_s0, %s4260_s17  ;;  %p4395_p8 = scmp.ne.s32.totalorder %s251_s10, %s4394_s9 }
  0x2d   : > { %s4399_s11 = sshll.u32 %s4563_s8, 4  ;;  %s4400_s11 = int_to_ptr.vmem [resolvable:$false] %s4399_s11 }
  0x2e   : > { %p4397_p9 = pnand %p4395_p8, %p4383_p6  ;;  %s4401_s15 = scalar_lea.vmem %s4400_s11, 8192 }
  0x2f   : > { %p4402_p5 = scmp.lt.s32.totalorder %s251_s10, %s4400_s11  ;;  %p4403_p11 = scmp.lt.s32.totalorder %s4401_s15, %s4394_s9 }
  0x30   : > { %p4398_p10 = pneg %p4397_p9 }
  0x31   : > { %p4404_p13 = por %p4403_p11, %p4402_p5 }
  0x33   : > { %p4405_p0 = pnand %p4404_p13, %p4398_p10 }
  0x35   : > { %4408 = shalt.err (!%p4405_p0)
}
  0x36   : > { %s4564_s17 = smov 8192   ;;  %s4565_s14 = smov 2048  }
  0x37   : > { %s4566_s20 = smov 128   ;;  %p279_p1 = scmp.lt.s32.totalorder %s4561_s7, 5 }
  0x38   : > { %4271 = dma.hbm_to_vmem [thread:$0]  (!%p4723_p3), %s249_s24, 4096, %s251_s10, %s238_s30, %s4564_s17, %s4565_s14, %s4566_s20  }
  0x39   : > { %s4067_s8 = sshll.u32 %s4710_s18, 5  ;;  %s4261_s0 = sshll.u32 %s4666_s13, 9 }
  0x3a   : > { %p4741_p8 = pnand %p4071_p4, %p279_p1  ;;  %s272_s26 = scalar_lea.hbm %s5753_s1, %s4261_s0 }
  0x3b   : > { %s264_s12 = scalar_lea.vmem [#allocation5], %s4067_s8  ;;  %s261_s19 = scalar_lea.sflag [#allocation6], %s4710_s18 }
  0x3c   : > { %s274_s23 = sshll.u32 %s264_s12, 4  ;;  %s4567_s30 = smov [#allocation5]   ;;  %s275_s23 = int_to_ptr.vmem [resolvable:$true] %s274_s23 }
  0x3d   : > { %s4422_s21 = scalar_lea.vmem %s275_s23, 512  ;;  %s4427_s10 = sshll.u32 %s4567_s30, 4  ;;  %s4428_s10 = int_to_ptr.vmem [resolvable:$false] %s4427_s10 }
  0x3e   : > { %p4423_p9 = scmp.ne.s32.totalorder %s275_s23, %s4422_s21  ;;  %s4429_s13 = scalar_lea.vmem %s4428_s10, 1024 }
  0x3f   : > { %p4430_p4 = scmp.lt.s32.totalorder %s275_s23, %s4428_s10  ;;  %p4431_p11 = scmp.lt.s32.totalorder %s4429_s13, %s4422_s21 }
  0x40   : > { %p4425_p10 = pnand %p4423_p9, %p4383_p6 }
  0x41   : > { %p4432_p13 = por %p4431_p11, %p4430_p4 }
  0x42   : > { %p4426_p5 = pneg %p4425_p10 }
  0x44   : > { %p4433_p0 = pnand %p4432_p13, %p4426_p5 }
  0x46   : > { %4436 = shalt.err (!%p4433_p0)
}
  0x47   : > { %4274 = dma.hbm_to_vmem [thread:$0]  (!%p4723_p3), %s272_s26, 512, %s275_s23, %s261_s19  }
  0x48   : > { %283 = sbr.rel (%p4741_p8) target bundleno = 870 (0x366), region = 44  ;;  %s285_s0 = sand.u32 (!%p4741_p8), 1, %s4537_s25  }
  0x49   : > { %s4072_s12 = sshll.u32 (!%p4741_p8), %s285_s0, 8  ;;  %s286_s18 = scalar_lea.sflag (!%p4741_p8), [#allocation3], %s285_s0 }
  0x4a   : > { %s4757_s24 = scalar_lea.vmem (!%p4741_p8), [#allocation2], %s4072_s12 }
  0x4d   : > { %4508 = dma.done.wait (%p4682_p7), %s286_s18, 4096  }
  0x4e   : > { %4510 = vsyncadd (%p4682_p7), %s286_s18, 4294963200  ;;  %s4073_s21 = sshll.u32 %s285_s0, 5  ;;  %s295_s17 = scalar_lea.sflag [#allocation6], %s285_s0 }
  0x4f   : > { %s4763_s6 = scalar_lea.vmem [#allocation5], %s4073_s21 }
  0x50   : > { %4512 = dma.done.wait (%p4682_p7), %s295_s17, 512  }
  0x51   : > { %4514 = vsyncadd (%p4682_p7), %s295_s17, 4294966784  ;;  %s329_s23 = sand.u32 1, %s4525_s22   ;;  %p4075_p3 = scmp.ne.s32.totalorder %s4545_s27, 0 }
  0x52   : > { %s4074_s26 = sshll.u32 %s329_s23, 3 }
  0x53   : > { %s4772_s19 = scalar_lea.vmem [#allocation7], %s4074_s26  ;;  %342 = sbr.rel (%p4075_p3) target bundleno = 90 (0x5a), region = 56 }
  0x58   : > { %vm343_vm0 = vcmask 261120   ;;  %v4568_v0 = vmov 0.0  }
  0x59   : > { %344 = vst.msk [vmem:[%s4772_s19] sm:$0xff] %vm343_vm0, %v4568_v0 }
  0x5a PF: > { %v349_v1 = vld [vmem:[%s4757_s24] sm:$0xff]  ;;  %vm550_vm1 = vcmask 1045504   ;;  %v350_v3 = vld [vmem:[%s4757_s24 + $0x8] sm:$0xff]  ;;  %v4569_v7 = vmov 0   ;;  %v351_v12 = vld [vmem:[%s4757_s24 + $0x10] sm:$0xff]  ;;  %vm543_vm2 = vcmask 97280  }
  0x5b   : > { %v365_v2 = vld [vmem:[%s4757_s24 + $0x80] sm:$0x33]  ;;  %v366_v5 = vld [vmem:[%s4757_s24 + $0x88] sm:$0x33]  ;;  %679 = vmatprep.mubr.bf16.mxu0 %v4569_v7  ;;  %732 = vmatprep.mubr.bf16.mxu1 %v4569_v7  ;;  %v367_v13 = vld [vmem:[%s4757_s24 + $0x90] sm:$0x33] }
  0x5c   : > { %v4079_v4 = vcombine.high %v349_v1, %v365_v2  ;;  %v4078_v6 = vcombine.low %v349_v1, %v365_v2  ;;  %v4081_v8 = vcombine.high %v350_v3, %v366_v5  ;;  %v4080_v9 = vcombine.low %v350_v3, %v366_v5  ;;  %4375 = vset.pattern.permute.xlu0 %v4569_v7  ;;  %v4789_v11 = vld [vmem:[%s5754_s2] sm:$0xff]   ;;  %v352_v17 = vld [vmem:[%s4757_s24 + $0x18] sm:$0xff]  ;;  %v354_v23 = vld [vmem:[%s4757_s24 + $0x28] sm:$0xff]  ;;  %s3947_s11 = sshll.u32 %s4772_s19, 4  ;;  %s5790_s10 = sld [smem:[#allocation22_spill]]  ;;  %s3948_s11 = int_to_ptr.vmem [resolvable:$true] %s3947_s11 }
  0x5d   : > { %4376 = vset.pattern.permute.xlu1 %v4569_v7  ;;  %v4083_v15 = vcombine.high %v351_v12, %v367_v13  ;;  %v4082_v16 = vcombine.low %v351_v12, %v367_v13  ;;  %v368_v18 = vld [vmem:[%s4757_s24 + $0x98] sm:$0x33]  ;;  %v353_v19 = vld [vmem:[%s4757_s24 + $0x20] sm:$0xff]  ;;  %v370_v24 = vld [vmem:[%s4757_s24 + $0xa8] sm:$0x33]  ;;  %vm1725_vm3 = vcmask 261120  }
  0x5e   : > { %4110 = vmatprep.subr.msk.bf16.mxu0 %vm550_vm1, %v4079_v4  ;;  %v552_v10 = vsel %vm550_vm1, %v4078_v6, 0  ;;  %4113 = vmatprep.subr.msk.bf16.mxu1 %vm550_vm1, %v4081_v8  ;;  %v558_v14 = vsel %vm550_vm1, %v4080_v9, 0  ;;  %v4085_v20 = vcombine.high %v352_v17, %v368_v18  ;;  %v4084_v21 = vcombine.low %v352_v17, %v368_v18  ;;  %v369_v22 = vld [vmem:[%s4757_s24 + $0xa0] sm:$0x33]  ;;  %v383_v29 = vld [vmem:[%s5755_s3 + $0x10] sm:$0xff]  ;;  %v4821_v31 = vld [vmem:[%s5754_s2 + $0x8] sm:$0xff]  }
  0x5f   : > { %662 = vmatpush1.bf16.msra.mxu0 %v552_v10  ;;  %715 = vmatpush1.bf16.msra.mxu1 %v558_v14  ;;  %v564_v25 = vsel %vm550_vm1, %v4082_v16, 0  ;;  %v4087_v26 = vcombine.high %v353_v19, %v369_v22  ;;  %v4089_v28 = vcombine.high %v354_v23, %v370_v24  ;;  %v381_v30 = vld [vmem:[%s5755_s3] sm:$0xff]  ;;  %v384_v32 = vld [vmem:[%s5755_s3 + $0x18] sm:$0xff]  ;;  %v382_v33 = vld [vmem:[%s5755_s3 + $0x8] sm:$0xff]  ;;  %v4086_v35 = vcombine.low %v353_v19, %v369_v22  ;;  %s3934_s0 = scalar_lea.sflag [#allocation4], %s329_s23  ;;  %s4437_s12 = scalar_lea.vmem %s3948_s11, 128 }
  0x60   : > { %4116 = vmatprep.subr.msk.bf16.mxu0 %vm550_vm1, %v4083_v15  ;;  %4119 = vmatprep.subr.msk.bf16.mxu1 %vm550_vm1, %v4085_v20  ;;  %v570_v27 = vsel %vm550_vm1, %v4084_v21, 0  ;;  %v1694_v34 = vld [vmem:[%s5757_s5 + $0x18] sm:$0xff]  ;;  %v1693_v36 = vld [vmem:[%s5757_s5 + $0x10] sm:$0xff]  ;;  %v4088_v37 = vcombine.low %v354_v23, %v370_v24  ;;  %v1692_v42 = vld [vmem:[%s5757_s5 + $0x8] sm:$0xff]  ;;  %p4438_p7 = scmp.ne.s32.totalorder %s3948_s11, %s4437_s12  ;;  %s4571_s18 = smov [#allocation7]  }
  0x61   : > { %397 = vperm.xlu0 %4375, %v383_v29   ;;  %387 = vperm.xlu1 %4376, %v381_v30   ;;  %v355_v38 = vld [vmem:[%s4757_s24 + $0x30] sm:$0xff]  ;;  %v356_v40 = vld [vmem:[%s4757_s24 + $0x38] sm:$0xff]  ;;  %v576_v43 = vsel %vm550_vm1, %v4086_v35, 0  ;;  %v1691_v47 = vld [vmem:[%s5757_s5] sm:$0xff] }
  0x62   : > { %4111 = vmatmul.mubr.msk.bf16.vlgmr.msra.gmra.mxu0 %vm543_vm2, %v4789_v11  ;;  %4114 = vmatmul.mubr.msk.bf16.vlgmr.msra.gmra.mxu1 %vm543_vm2, %v4789_v11  ;;  %v371_v39 = vld [vmem:[%s4757_s24 + $0xb0] sm:$0x33]  ;;  %v372_v41 = vld [vmem:[%s4757_s24 + $0xb8] sm:$0x33]  ;;  %v582_v45 = vsel %vm550_vm1, %v4088_v37, 0  ;;  %v357_v50 = vld [vmem:[%s4757_s24 + $0x40] sm:$0xff]  ;;  %p4439_p6 = pnand %p4438_p7, %p4700_p12 }
  0x63   : > { %689 = vmatprep.mubr.bf16.mxu0 %v4569_v7  ;;  %742 = vmatprep.mubr.bf16.mxu1 %v4569_v7  ;;  %v4091_v44 = vcombine.high %v355_v38, %v371_v39  ;;  %v4093_v46 = vcombine.high %v356_v40, %v372_v41  ;;  %v4090_v48 = vcombine.low %v355_v38, %v371_v39  ;;  %v373_v51 = vld [vmem:[%s4757_s24 + $0xc0] sm:$0x33]  ;;  %v358_v52 = vld [vmem:[%s4757_s24 + $0x48] sm:$0xff]  ;;  %v359_v60 = vld [vmem:[%s4757_s24 + $0x50] sm:$0xff] }
  0x64   : > { %768 = vmatpush1.bf16.msra.mxu0 %v564_v25  ;;  %821 = vmatpush1.bf16.msra.mxu1 %v570_v27  ;;  %v4092_v49 = vcombine.low %v356_v40, %v372_v41  ;;  %v374_v53 = vld [vmem:[%s4757_s24 + $0xc8] sm:$0x33]  ;;  %v4095_v55 = vcombine.high %v357_v50, %v373_v51  ;;  %v4094_v58 = vcombine.low %v357_v50, %v373_v51  ;;  %v375_v61 = vld [vmem:[%s4757_s24 + $0xd0] sm:$0x33]  ;;  %v360_v62 = vld [vmem:[%s4757_s24 + $0x58] sm:$0xff]  ;;  %p4440_p1 = pneg %p4439_p6 }
  0x65   : > { %4122 = vmatprep.subr.msk.bf16.mxu0 %vm550_vm1, %v4087_v26  ;;  %4125 = vmatprep.subr.msk.bf16.mxu1 %vm550_vm1, %v4089_v28  ;;  %v588_v54 = vsel %vm550_vm1, %v4090_v48, 0  ;;  %v4097_v57 = vcombine.high %v358_v52, %v374_v53  ;;  %v4096_v59 = vcombine.low %v358_v52, %v374_v53  ;;  %v376_v63 = vld [vmem:[%s4757_s24 + $0xd8] sm:$0x33]  ;;  %v4099_v1 = vcombine.high %v359_v60, %v375_v61  ;;  %v361_v6 = vld [vmem:[%s4757_s24 + $0x60] sm:$0xff]  ;;  %v362_v9 = vld [vmem:[%s4757_s24 + $0x68] sm:$0xff] }
  0x66   : > { %402 = vperm.xlu0 %4375, %v384_v32   ;;  %392 = vperm.xlu1 %4376, %v382_v33   ;;  %v594_v56 = vsel %vm550_vm1, %v4092_v49, 0  ;;  %v600_v0 = vsel %vm550_vm1, %v4094_v58, 0  ;;  %v4101_v3 = vcombine.high %v360_v62, %v376_v63  ;;  %v4098_v4 = vcombine.low %v359_v60, %v375_v61  ;;  %v377_v8 = vld [vmem:[%s4757_s24 + $0xe0] sm:$0x33]  ;;  %v378_v10 = vld [vmem:[%s4757_s24 + $0xe8] sm:$0x33] }
  0x67   : > { %v606_v2 = vsel %vm550_vm1, %v4096_v59, 0  ;;  %v4100_v5 = vcombine.low %v360_v62, %v376_v63  ;;  %v4103_v13 = vcombine.high %v361_v6, %v377_v8  ;;  %v4105_v15 = vcombine.high %v362_v9, %v378_v10  ;;  %v363_v18 = vld [vmem:[%s4757_s24 + $0x70] sm:$0xff]  ;;  %v364_v20 = vld [vmem:[%s4757_s24 + $0x78] sm:$0xff] }
  0x68   : > { %v612_v12 = vsel %vm550_vm1, %v4098_v4, 0  ;;  %v4102_v16 = vcombine.low %v361_v6, %v377_v8  ;;  %v4104_v17 = vcombine.low %v362_v9, %v378_v10  ;;  %v379_v19 = vld [vmem:[%s4757_s24 + $0xf0] sm:$0x33]  ;;  %v380_v21 = vld [vmem:[%s4757_s24 + $0xf8] sm:$0x33] }
  0x69   : > { %v618_v14 = vsel %vm550_vm1, %v4100_v5, 0  ;;  %v4107_v23 = vcombine.high %v363_v18, %v379_v19  ;;  %v4109_v25 = vcombine.high %v364_v20, %v380_v21  ;;  %v4106_v26 = vcombine.low %v363_v18, %v379_v19 }
  0x6a   : > { %4112 = vmatmul.mubr.msk.bf16.gmra.mxu0 %vm543_vm2, %v4821_v31  ;;  %4115 = vmatmul.mubr.msk.bf16.gmra.mxu1 %vm543_vm2, %v4821_v31  ;;  %v624_v22 = vsel %vm550_vm1, %v4102_v16, 0  ;;  %v630_v24 = vsel %vm550_vm1, %v4104_v17, 0  ;;  %v4108_v27 = vcombine.low %v364_v20, %v380_v21 }
  0x6b   : > { %785 = vmatprep.mubr.bf16.mxu0 %v4569_v7  ;;  %838 = vmatprep.mubr.bf16.mxu1 %v4569_v7  ;;  %v636_v28 = vsel %vm550_vm1, %v4106_v26, 0 }
  0x6c   : > { %1712 = vperm.xlu0 %4375, %v1694_v34   ;;  %1707 = vperm.xlu1 %4376, %v1693_v36   ;;  %v642_v29 = vsel %vm550_vm1, %v4108_v27, 0 }
  0x70   : > { %1702 = vperm.xlu0 %4375, %v1692_v42   ;;  %1697 = vperm.xlu1 %4376, %v1691_v47  }
  0x72   : > { %4117 = vmatmul.mubr.msk.bf16.vlgmr.msra.gmra.mxu0 %vm543_vm2, %v4789_v11  ;;  %4120 = vmatmul.mubr.msk.bf16.vlgmr.msra.gmra.mxu1 %vm543_vm2, %v4789_v11 }
  0x73   : > { %795 = vmatprep.mubr.bf16.mxu0 %v4569_v7  ;;  %848 = vmatprep.mubr.bf16.mxu1 %v4569_v7 }
  0x74   : > { %874 = vmatpush1.bf16.msra.mxu0 %v576_v43  ;;  %927 = vmatpush1.bf16.msra.mxu1 %v582_v45 }
  0x75   : > { %4128 = vmatprep.subr.msk.bf16.mxu0 %vm550_vm1, %v4091_v44  ;;  %4131 = vmatprep.subr.msk.bf16.mxu1 %vm550_vm1, %v4093_v46 }
  0x7a   : > { %4118 = vmatmul.mubr.msk.bf16.gmra.mxu0 %vm543_vm2, %v4821_v31  ;;  %4121 = vmatmul.mubr.msk.bf16.gmra.mxu1 %vm543_vm2, %v4821_v31 }
  0x7b   : > { %891 = vmatprep.mubr.bf16.mxu0 %v4569_v7  ;;  %944 = vmatprep.mubr.bf16.mxu1 %v4569_v7 }
  0x82   : > { %4123 = vmatmul.mubr.msk.bf16.vlgmr.msra.gmra.mxu0 %vm543_vm2, %v4789_v11  ;;  %4126 = vmatmul.mubr.msk.bf16.vlgmr.msra.gmra.mxu1 %vm543_vm2, %v4789_v11 }
  0x83   : > { %901 = vmatprep.mubr.bf16.mxu0 %v4569_v7  ;;  %954 = vmatprep.mubr.bf16.mxu1 %v4569_v7 }
  0x84   : > { %980 = vmatpush1.bf16.msra.mxu0 %v588_v54  ;;  %1033 = vmatpush1.bf16.msra.mxu1 %v594_v56 }
  0x85   : > { %4134 = vmatprep.subr.msk.bf16.mxu0 %vm550_vm1, %v4095_v55  ;;  %4137 = vmatprep.subr.msk.bf16.mxu1 %vm550_vm1, %v4097_v57 }
  0x8a   : > { %4124 = vmatmul.mubr.msk.bf16.gmra.mxu0 %vm543_vm2, %v4821_v31  ;;  %4127 = vmatmul.mubr.msk.bf16.gmra.mxu1 %vm543_vm2, %v4821_v31 }
  0x8b   : > { %997 = vmatprep.mubr.bf16.mxu0 %v4569_v7  ;;  %1050 = vmatprep.mubr.bf16.mxu1 %v4569_v7 }
  0x92   : > { %4129 = vmatmul.mubr.msk.bf16.vlgmr.msra.gmra.mxu0 %vm543_vm2, %v4789_v11  ;;  %4132 = vmatmul.mubr.msk.bf16.vlgmr.msra.gmra.mxu1 %vm543_vm2, %v4789_v11 }
  0x93   : > { %1007 = vmatprep.mubr.bf16.mxu0 %v4569_v7  ;;  %1060 = vmatprep.mubr.bf16.mxu1 %v4569_v7 }
  0x94   : > { %1086 = vmatpush1.bf16.msra.mxu0 %v600_v0  ;;  %1139 = vmatpush1.bf16.msra.mxu1 %v606_v2 }
  0x95   : > { %4140 = vmatprep.subr.msk.bf16.mxu0 %vm550_vm1, %v4099_v1  ;;  %4143 = vmatprep.subr.msk.bf16.mxu1 %vm550_vm1, %v4101_v3 }
  0x9a   : > { %4130 = vmatmul.mubr.msk.bf16.gmra.mxu0 %vm543_vm2, %v4821_v31  ;;  %4133 = vmatmul.mubr.msk.bf16.gmra.mxu1 %vm543_vm2, %v4821_v31 }
  0x9b   : > { %1103 = vmatprep.mubr.bf16.mxu0 %v4569_v7  ;;  %1156 = vmatprep.mubr.bf16.mxu1 %v4569_v7 }
  0xa2   : > { %4135 = vmatmul.mubr.msk.bf16.vlgmr.msra.gmra.mxu0 %vm543_vm2, %v4789_v11  ;;  %4138 = vmatmul.mubr.msk.bf16.vlgmr.msra.gmra.mxu1 %vm543_vm2, %v4789_v11 }
  0xa3   : > { %1113 = vmatprep.mubr.bf16.mxu0 %v4569_v7  ;;  %1166 = vmatprep.mubr.bf16.mxu1 %v4569_v7 }
  0xa4   : > { %1192 = vmatpush1.bf16.msra.mxu0 %v612_v12  ;;  %1245 = vmatpush1.bf16.msra.mxu1 %v618_v14 }
  0xa5   : > { %4146 = vmatprep.subr.msk.bf16.mxu0 %vm550_vm1, %v4103_v13  ;;  %4149 = vmatprep.subr.msk.bf16.mxu1 %vm550_vm1, %v4105_v15 }
  0xaa   : > { %4136 = vmatmul.mubr.msk.bf16.gmra.mxu0 %vm543_vm2, %v4821_v31  ;;  %4139 = vmatmul.mubr.msk.bf16.gmra.mxu1 %vm543_vm2, %v4821_v31 }
  0xab   : > { %1209 = vmatprep.mubr.bf16.mxu0 %v4569_v7  ;;  %1262 = vmatprep.mubr.bf16.mxu1 %v4569_v7 }
  0xb2   : > { %4141 = vmatmul.mubr.msk.bf16.vlgmr.msra.gmra.mxu0 %vm543_vm2, %v4789_v11  ;;  %4144 = vmatmul.mubr.msk.bf16.vlgmr.msra.gmra.mxu1 %vm543_vm2, %v4789_v11 }
  0xb3   : > { %1219 = vmatprep.mubr.bf16.mxu0 %v4569_v7  ;;  %1272 = vmatprep.mubr.bf16.mxu1 %v4569_v7 }
  0xb4   : > { %1298 = vmatpush1.bf16.msra.mxu0 %v624_v22  ;;  %1351 = vmatpush1.bf16.msra.mxu1 %v630_v24 }
  0xb5   : > { %4152 = vmatprep.subr.msk.bf16.mxu0 %vm550_vm1, %v4107_v23  ;;  %4155 = vmatprep.subr.msk.bf16.mxu1 %vm550_vm1, %v4109_v25 }
  0xba   : > { %4142 = vmatmul.mubr.msk.bf16.gmra.mxu0 %vm543_vm2, %v4821_v31  ;;  %4145 = vmatmul.mubr.msk.bf16.gmra.mxu1 %vm543_vm2, %v4821_v31 }
  0xbb   : > { %1315 = vmatprep.mubr.bf16.mxu0 %v4569_v7  ;;  %1368 = vmatprep.mubr.bf16.mxu1 %v4569_v7 }
  0xc2   : > { %4147 = vmatmul.mubr.msk.bf16.vlgmr.msra.gmra.mxu0 %vm543_vm2, %v4789_v11  ;;  %4150 = vmatmul.mubr.msk.bf16.vlgmr.msra.gmra.mxu1 %vm543_vm2, %v4789_v11 }
  0xc3   : > { %1325 = vmatprep.mubr.bf16.mxu0 %v4569_v7  ;;  %1378 = vmatprep.mubr.bf16.mxu1 %v4569_v7 }
  0xc4   : > { %1404 = vmatpush1.bf16.msra.mxu0 %v636_v28  ;;  %1457 = vmatpush1.bf16.msra.mxu1 %v642_v29 }
  0xca   : > { %4148 = vmatmul.mubr.msk.bf16.gmra.mxu0 %vm543_vm2, %v4821_v31  ;;  %4151 = vmatmul.mubr.msk.bf16.gmra.mxu1 %vm543_vm2, %v4821_v31 }
  0xcb   : > { %1421 = vmatprep.mubr.bf16.mxu0 %v4569_v7  ;;  %1474 = vmatprep.mubr.bf16.mxu1 %v4569_v7 }
  0xd2   : > { %4153 = vmatmul.mubr.msk.bf16.vlgmr.msra.gmra.mxu0 %vm543_vm2, %v4789_v11  ;;  %4156 = vmatmul.mubr.msk.bf16.vlgmr.msra.gmra.mxu1 %vm543_vm2, %v4789_v11 }
  0xd3   : > { %1431 = vmatprep.mubr.bf16.mxu0 %v4569_v7  ;;  %1484 = vmatprep.mubr.bf16.mxu1 %v4569_v7 }
  0xda   : > { %4154 = vmatmul.mubr.msk.bf16.gmra.mxu0 %vm543_vm2, %v4821_v31  ;;  %4157 = vmatmul.mubr.msk.bf16.gmra.mxu1 %vm543_vm2, %v4821_v31 }
  0xdb   : > { %1764 = vmatprep.mubr.bf16.mxu0 %v4569_v7  ;;  %1817 = vmatprep.mubr.bf16.mxu1 %v4569_v7 }
  0xdc   : > { %v4974_v11 = vpop.permute.xlu0 %397  ;;  %v4976_v37 = vpop.permute.xlu1 %387 }
  0xe1   : > { %v4978_v31 = vpop.permute.xlu0 %402  ;;  %v4980_v44 = vpop.permute.xlu1 %392 }
 0x122   : > { %v681_v30 = vpop.f32.mrf.mxu0  ;;  %v734_v32 = vpop.f32.mrf.mxu1 }
 0x123   : > { %v682_v46 = vadd.f32 %v681_v30, %v4976_v37  ;;  %v735_v14 = vadd.f32 %v734_v32, %v4976_v37 }
 0x124   : > { %v683_v33 = vpop.f32.mrf.mxu0  ;;  %v736_v34 = vpop.f32.mrf.mxu1 }
 0x125   : > { %v684_v56 = vadd.f32 %v683_v33, %v4976_v37  ;;  %v737_v57 = vadd.f32 %v736_v34, %v4976_v37  ;;  %v1495_v28 = vmax.f32 %v682_v46, 0.0  ;;  %v1497_v32 = vmax.f32 %v735_v14, 0.0 }
 0x126   : > { %v685_v35 = vpop.f32.mrf.mxu0  ;;  %v738_v36 = vpop.f32.mrf.mxu1 }
 0x127   : > { %v686_v61 = vadd.f32 %v685_v35, %v4980_v44  ;;  %v739_v62 = vadd.f32 %v738_v36, %v4980_v44  ;;  %v1496_v15 = vmax.f32 %v684_v56, 0.0  ;;  %v1498_v19 = vmax.f32 %v737_v57, 0.0 }
 0x128   : > { %v687_v38 = vpop.f32.mrf.mxu0  ;;  %v740_v39 = vpop.f32.mrf.mxu1 }
 0x129   : > { %v688_v47 = vadd.f32 %v687_v38, %v4980_v44  ;;  %v741_v51 = vadd.f32 %v740_v39, %v4980_v44  ;;  %v1527_v20 = vmax.f32 %v686_v61, 0.0  ;;  %v1529_v24 = vmax.f32 %v739_v62, 0.0  ;;  %v5003_v39 = vld [vmem:[%s5756_s4] sm:$0xff]  }
 0x12a   : > { %v691_v40 = vpop.f32.mrf.mxu0  ;;  %v744_v41 = vpop.f32.mrf.mxu1 }
 0x12b   : > { %v692_v52 = vadd.f32 %v691_v40, %v4974_v11  ;;  %v745_v58 = vadd.f32 %v744_v41, %v4974_v11  ;;  %v1528_v2 = vmax.f32 %v688_v47, 0.0  ;;  %v1530_v8 = vmax.f32 %v741_v51, 0.0 }
 0x12c   : > { %v693_v42 = vpop.f32.mrf.mxu0  ;;  %v746_v43 = vpop.f32.mrf.mxu1  ;;  %v1627_v34 = vpack.c.bf16 %v1527_v20, %v1495_v28  ;;  %v1629_v36 = vpack.c.bf16 %v1529_v24, %v1497_v32 }
 0x12d   : > { %v694_v48 = vadd.f32 %v693_v42, %v4974_v11  ;;  %v747_v53 = vadd.f32 %v746_v43, %v4974_v11  ;;  %v1559_v9 = vmax.f32 %v692_v52, 0.0  ;;  %v1561_v16 = vmax.f32 %v745_v58, 0.0 }
 0x12e   : > { %v695_v45 = vpop.f32.mrf.mxu0  ;;  %v748_v50 = vpop.f32.mrf.mxu1  ;;  %v1628_v27 = vpack.c.bf16 %v1528_v2, %v1496_v15  ;;  %v1630_v30 = vpack.c.bf16 %v1530_v8, %v1498_v19 }
 0x12f   : > { %v696_v49 = vadd.f32 %v695_v45, %v4978_v31  ;;  %v749_v54 = vadd.f32 %v748_v50, %v4978_v31  ;;  %v1560_v3 = vmax.f32 %v694_v48, 0.0  ;;  %v1562_v10 = vmax.f32 %v747_v53, 0.0 }
 0x130   : > { %v697_v55 = vpop.f32.mrf.mxu0  ;;  %v750_v60 = vpop.f32.mrf.mxu1 }
 0x131   : > { %v698_v59 = vadd.f32 %v697_v55, %v4978_v31  ;;  %v1591_v63 = vmax.f32 %v696_v49, 0.0  ;;  %v751_v0 = vadd.f32 %v750_v60, %v4978_v31  ;;  %v1593_v4 = vmax.f32 %v749_v54, 0.0 }
 0x132   : > { %v787_v1 = vpop.f32.mrf.mxu0  ;;  %v4997_v6 = vpop.f32.mrf.mxu1 }
 0x133   : > { %v1592_v5 = vmax.f32 %v698_v59, 0.0  ;;  %v1594_v12 = vmax.f32 %v751_v0, 0.0  ;;  %v1659_v21 = vpack.c.bf16 %v1591_v63, %v1559_v9  ;;  %v1661_v25 = vpack.c.bf16 %v1593_v4, %v1561_v16  ;;  %v5035_v4 = vld [vmem:[%s5756_s4 + $0x8] sm:$0xff]  }
 0x134   : > { %v789_v13 = vpop.f32.mrf.mxu0  ;;  %v842_v17 = vpop.f32.mrf.mxu1  ;;  %v5006_v43 = vadd.f32 %v787_v1, %v4976_v37 }
 0x135   : > { %v1660_v18 = vpack.c.bf16 %v1592_v5, %v1560_v3  ;;  %v1662_v23 = vpack.c.bf16 %v1594_v12, %v1562_v10  ;;  %v790_v53 = vadd.f32 %v789_v13, %v4976_v37  ;;  %v843_v58 = vadd.f32 %v842_v17, %v4976_v37 }
 0x136   : > { %v791_v22 = vpop.f32.mrf.mxu0  ;;  %v844_v26 = vpop.f32.mrf.mxu1  ;;  %v841_v13 = vadd.f32 %v4997_v6, %v4976_v37 }
 0x137   : > { %1744 = vmatprep.subr.bf16.mxu0 %v1660_v18  ;;  %1797 = vmatprep.subr.bf16.mxu1 %v1662_v23  ;;  %v792_v59 = vadd.f32 %v791_v22, %v4980_v44  ;;  %v845_v60 = vadd.f32 %v844_v26, %v4980_v44  ;;  %v1500_v18 = vmax.f32 %v790_v53, 0.0  ;;  %v1502_v19 = vmax.f32 %v843_v58, 0.0 }
 0x138   : > { %v793_v29 = vpop.f32.mrf.mxu0  ;;  %1745 = vmatpush1.bf16.msra.mxu0 %v1659_v21  ;;  %v846_v33 = vpop.f32.mrf.mxu1  ;;  %1798 = vmatpush1.bf16.msra.mxu1 %v1661_v25 }
 0x139   : > { %1746 = vmatprep.subr.bf16.mxu0 %v1628_v27  ;;  %1799 = vmatprep.subr.bf16.mxu1 %v1630_v30  ;;  %v794_v45 = vadd.f32 %v793_v29, %v4980_v44  ;;  %v847_v49 = vadd.f32 %v846_v33, %v4980_v44  ;;  %v1531_v22 = vmax.f32 %v792_v59, 0.0  ;;  %v1533_v23 = vmax.f32 %v845_v60, 0.0 }
 0x13a   : > { %v797_v35 = vpop.f32.mrf.mxu0  ;;  %v850_v38 = vpop.f32.mrf.mxu1  ;;  %v1499_v29 = vmax.f32 %v5006_v43, 0.0  ;;  %v1501_v30 = vmax.f32 %v841_v13, 0.0 }
 0x13b   : > { %v798_v54 = vadd.f32 %v797_v35, %v4974_v11  ;;  %v851_v55 = vadd.f32 %v850_v38, %v4974_v11  ;;  %v1532_v5 = vmax.f32 %v794_v45, 0.0  ;;  %v1534_v8 = vmax.f32 %v847_v49, 0.0 }
 0x13c   : > { %v799_v40 = vpop.f32.mrf.mxu0  ;;  %1747 = vmatpush1.bf16.msra.mxu0 %v1627_v34  ;;  %v852_v41 = vpop.f32.mrf.mxu1  ;;  %1800 = vmatpush1.bf16.msra.mxu1 %v1629_v36  ;;  %v1631_v34 = vpack.c.bf16 %v1531_v22, %v1499_v29  ;;  %v1633_v35 = vpack.c.bf16 %v1533_v23, %v1501_v30 }
 0x13d   : > { %v800_v46 = vadd.f32 %v799_v40, %v4974_v11  ;;  %v853_v50 = vadd.f32 %v852_v41, %v4974_v11  ;;  %v1563_v14 = vmax.f32 %v798_v54, 0.0  ;;  %v1565_v15 = vmax.f32 %v851_v55, 0.0 }
 0x13e   : > { %v801_v42 = vpop.f32.mrf.mxu0  ;;  %v854_v48 = vpop.f32.mrf.mxu1  ;;  %v1632_v27 = vpack.c.bf16 %v1532_v5, %v1500_v18  ;;  %v1634_v28 = vpack.c.bf16 %v1534_v8, %v1502_v19 }
 0x13f   : > { %v802_v47 = vadd.f32 %v801_v42, %v4978_v31  ;;  %4160 = vmatmul.mubr.msk.bf16.vlgmr.msra.gmra.mxu0 %vm1725_vm3, %v5003_v39  ;;  %v855_v51 = vadd.f32 %v854_v48, %v4978_v31  ;;  %4162 = vmatmul.mubr.msk.bf16.vlgmr.msra.gmra.mxu1 %vm1725_vm3, %v5003_v39  ;;  %v1564_v63 = vmax.f32 %v800_v46, 0.0  ;;  %v1566_v9 = vmax.f32 %v853_v50, 0.0 }
 0x140   : > { %v803_v52 = vpop.f32.mrf.mxu0  ;;  %1774 = vmatprep.mubr.bf16.mxu0 %v4569_v7  ;;  %v856_v57 = vpop.f32.mrf.mxu1  ;;  %1827 = vmatprep.mubr.bf16.mxu1 %v4569_v7 }
 0x141   : > { %v804_v56 = vadd.f32 %v803_v52, %v4978_v31  ;;  %v857_v61 = vadd.f32 %v856_v57, %v4978_v31  ;;  %v1595_v0 = vmax.f32 %v802_v47, 0.0  ;;  %v1597_v1 = vmax.f32 %v855_v51, 0.0 }
 0x142   : > { %v5028_v62 = vpop.f32.mrf.mxu0  ;;  %v5030_v3 = vpop.f32.mrf.mxu1 }
 0x143   : > { %v1596_v2 = vmax.f32 %v804_v56, 0.0  ;;  %v1598_v10 = vmax.f32 %v857_v61, 0.0  ;;  %v1663_v24 = vpack.c.bf16 %v1595_v0, %v1563_v14  ;;  %v1665_v25 = vpack.c.bf16 %v1597_v1, %v1565_v15 }
 0x144   : > { %v895_v12 = vpop.f32.mrf.mxu0  ;;  %v948_v16 = vpop.f32.mrf.mxu1 }
 0x145   : > { %v1664_v17 = vpack.c.bf16 %v1596_v2, %v1564_v63  ;;  %v1666_v21 = vpack.c.bf16 %v1598_v10, %v1566_v9  ;;  %v896_v42 = vadd.f32 %v895_v12, %v4976_v37  ;;  %v949_v55 = vadd.f32 %v948_v16, %v4976_v37 }
 0x146   : > { %v897_v20 = vpop.f32.mrf.mxu0  ;;  %v950_v26 = vpop.f32.mrf.mxu1  ;;  %v894_v12 = vadd.f32 %v5028_v62, %v4976_v37 }
 0x147   : > { %4161 = vmatmul.mubr.msk.bf16.gmra.mxu0 %vm1725_vm3, %v5035_v4  ;;  %1850 = vmatprep.subr.bf16.mxu0 %v1664_v17  ;;  %v898_v56 = vadd.f32 %v897_v20, %v4980_v44  ;;  %v951_v60 = vadd.f32 %v950_v26, %v4980_v44  ;;  %v947_v17 = vadd.f32 %v5030_v3, %v4976_v37  ;;  %v1504_v18 = vmax.f32 %v896_v42, 0.0 }
 0x148   : > { %4163 = vmatmul.mubr.msk.bf16.gmra.mxu1 %vm1725_vm3, %v5035_v4  ;;  %1903 = vmatprep.subr.bf16.mxu1 %v1666_v21  ;;  %v899_v6 = vpop.f32.mrf.mxu0  ;;  %v952_v32 = vpop.f32.mrf.mxu1  ;;  %v1506_v22 = vmax.f32 %v949_v55, 0.0  ;;  %v1503_v3 = vmax.f32 %v894_v12, 0.0 }
 0x149   : > { %1851 = vmatpush1.bf16.msra.mxu0 %v1663_v24  ;;  %1904 = vmatpush1.bf16.msra.mxu1 %v1665_v25  ;;  %v900_v47 = vadd.f32 %v899_v6, %v4980_v44  ;;  %v953_v51 = vadd.f32 %v952_v32, %v4980_v44  ;;  %v1535_v23 = vmax.f32 %v898_v56, 0.0  ;;  %v1537_v26 = vmax.f32 %v951_v60, 0.0 }
 0x14a   : > { %1852 = vmatprep.subr.bf16.mxu0 %v1632_v27  ;;  %1905 = vmatprep.subr.bf16.mxu1 %v1634_v28  ;;  %v903_v33 = vpop.f32.mrf.mxu0  ;;  %v956_v36 = vpop.f32.mrf.mxu1  ;;  %v1505_v30 = vmax.f32 %v947_v17, 0.0 }
 0x14b   : > { %1870 = vmatprep.mubr.bf16.mxu0 %v4569_v7  ;;  %1923 = vmatprep.mubr.bf16.mxu1 %v4569_v7  ;;  %v904_v52 = vadd.f32 %v903_v33, %v4974_v11  ;;  %v957_v57 = vadd.f32 %v956_v36, %v4974_v11  ;;  %v1536_v2 = vmax.f32 %v900_v47, 0.0  ;;  %v1538_v13 = vmax.f32 %v953_v51, 0.0 }
 0x14c   : > { %v905_v38 = vpop.f32.mrf.mxu0  ;;  %v958_v40 = vpop.f32.mrf.mxu1  ;;  %v1635_v33 = vpack.c.bf16 %v1535_v23, %v1503_v3 }
 0x14d   : > { %1853 = vmatpush1.bf16.msra.mxu0 %v1631_v34  ;;  %1906 = vmatpush1.bf16.msra.mxu1 %v1633_v35  ;;  %v906_v43 = vadd.f32 %v905_v38, %v4974_v11  ;;  %v959_v48 = vadd.f32 %v958_v40, %v4974_v11  ;;  %v1567_v14 = vmax.f32 %v904_v52, 0.0  ;;  %v1569_v19 = vmax.f32 %v957_v57, 0.0 }
 0x14e   : > { %v907_v41 = vpop.f32.mrf.mxu0  ;;  %v960_v46 = vpop.f32.mrf.mxu1  ;;  %v1636_v27 = vpack.c.bf16 %v1536_v2, %v1504_v18  ;;  %v1638_v29 = vpack.c.bf16 %v1538_v13, %v1506_v22  ;;  %v1637_v35 = vpack.c.bf16 %v1537_v26, %v1505_v30 }
 0x14f   : > { %v908_v45 = vadd.f32 %v907_v41, %v4978_v31  ;;  %v961_v49 = vadd.f32 %v960_v46, %v4978_v31  ;;  %v1568_v61 = vmax.f32 %v906_v43, 0.0  ;;  %v1570_v5 = vmax.f32 %v959_v48, 0.0 }
 0x150   : > { %4164 = vmatmul.mubr.msk.bf16.vlgmr.msra.gmra.mxu0 %vm1725_vm3, %v5003_v39  ;;  %4166 = vmatmul.mubr.msk.bf16.vlgmr.msra.gmra.mxu1 %vm1725_vm3, %v5003_v39  ;;  %v909_v50 = vpop.f32.mrf.mxu0  ;;  %v962_v54 = vpop.f32.mrf.mxu1 }
 0x151   : > { %v910_v53 = vadd.f32 %v909_v50, %v4978_v31  ;;  %1880 = vmatprep.mubr.bf16.mxu0 %v4569_v7  ;;  %1933 = vmatprep.mubr.bf16.mxu1 %v4569_v7  ;;  %v963_v58 = vadd.f32 %v962_v54, %v4978_v31  ;;  %v1599_v63 = vmax.f32 %v908_v45, 0.0  ;;  %v1601_v8 = vmax.f32 %v961_v49, 0.0 }
 0x152   : > { %v5065_v59 = vpop.f32.mrf.mxu0  ;;  %v5068_v1 = vpop.f32.mrf.mxu1 }
 0x153   : > { %v1600_v0 = vmax.f32 %v910_v53, 0.0  ;;  %v1602_v9 = vmax.f32 %v963_v58, 0.0  ;;  %v1667_v24 = vpack.c.bf16 %v1599_v63, %v1567_v14  ;;  %v1669_v6 = vpack.c.bf16 %v1601_v8, %v1569_v19 }
 0x154   : > { %v1001_v10 = vpop.f32.mrf.mxu0  ;;  %v1054_v15 = vpop.f32.mrf.mxu1  ;;  %v1000_v13 = vadd.f32 %v5065_v59, %v4976_v37  ;;  %v1053_v18 = vadd.f32 %v5068_v1, %v4976_v37 }
 0x155   : > { %v1668_v16 = vpack.c.bf16 %v1600_v0, %v1568_v61  ;;  %v1670_v21 = vpack.c.bf16 %v1602_v9, %v1570_v5  ;;  %v1002_v45 = vadd.f32 %v1001_v10, %v4976_v37  ;;  %v1055_v54 = vadd.f32 %v1054_v15, %v4976_v37 }
 0x156   : > { %v1003_v20 = vpop.f32.mrf.mxu0  ;;  %v1056_v25 = vpop.f32.mrf.mxu1  ;;  %v1507_v3 = vmax.f32 %v1000_v13, 0.0 }
 0x157   : > { %1956 = vmatprep.subr.bf16.mxu0 %v1668_v16  ;;  %2009 = vmatprep.subr.bf16.mxu1 %v1670_v21  ;;  %v1004_v55 = vadd.f32 %v1003_v20, %v4980_v44  ;;  %v1057_v60 = vadd.f32 %v1056_v25, %v4980_v44  ;;  %v1508_v19 = vmax.f32 %v1002_v45, 0.0  ;;  %v1510_v23 = vmax.f32 %v1055_v54, 0.0 }
 0x158   : > { %4165 = vmatmul.mubr.msk.bf16.gmra.mxu0 %vm1725_vm3, %v5035_v4  ;;  %4167 = vmatmul.mubr.msk.bf16.gmra.mxu1 %vm1725_vm3, %v5035_v4  ;;  %v1005_v62 = vpop.f32.mrf.mxu0  ;;  %v1058_v28 = vpop.f32.mrf.mxu1 }
 0x159   : > { %1957 = vmatpush1.bf16.msra.mxu0 %v1667_v24  ;;  %2010 = vmatpush1.bf16.msra.mxu1 %v1669_v6  ;;  %v1006_v46 = vadd.f32 %v1005_v62, %v4980_v44  ;;  %v1059_v50 = vadd.f32 %v1058_v28, %v4980_v44  ;;  %v1539_v24 = vmax.f32 %v1004_v55, 0.0  ;;  %v1541_v6 = vmax.f32 %v1057_v60, 0.0 }
 0x15a   : > { %1958 = vmatprep.subr.bf16.mxu0 %v1636_v27  ;;  %v1009_v32 = vpop.f32.mrf.mxu0  ;;  %2011 = vmatprep.subr.bf16.mxu1 %v1638_v29  ;;  %v1062_v34 = vpop.f32.mrf.mxu1  ;;  %v1509_v29 = vmax.f32 %v1053_v18, 0.0 }
 0x15b   : > { %1976 = vmatprep.mubr.bf16.mxu0 %v4569_v7  ;;  %2029 = vmatprep.mubr.bf16.mxu1 %v4569_v7  ;;  %v1010_v51 = vadd.f32 %v1009_v32, %v4974_v11  ;;  %v1063_v56 = vadd.f32 %v1062_v34, %v4974_v11  ;;  %v1540_v5 = vmax.f32 %v1006_v46, 0.0  ;;  %v1542_v14 = vmax.f32 %v1059_v50, 0.0 }
 0x15c   : > { %v1011_v36 = vpop.f32.mrf.mxu0  ;;  %v1064_v38 = vpop.f32.mrf.mxu1  ;;  %v1639_v32 = vpack.c.bf16 %v1539_v24, %v1507_v3  ;;  %v1641_v34 = vpack.c.bf16 %v1541_v6, %v1509_v29 }
 0x15d   : > { %1959 = vmatpush1.bf16.msra.mxu0 %v1635_v33  ;;  %2012 = vmatpush1.bf16.msra.mxu1 %v1637_v35  ;;  %v1012_v41 = vadd.f32 %v1011_v36, %v4974_v11  ;;  %v1065_v47 = vadd.f32 %v1064_v38, %v4974_v11  ;;  %v1571_v15 = vmax.f32 %v1010_v51, 0.0  ;;  %v1573_v20 = vmax.f32 %v1063_v56, 0.0 }
 0x15e   : > { %v1013_v40 = vpop.f32.mrf.mxu0  ;;  %v1066_v43 = vpop.f32.mrf.mxu1  ;;  %v1640_v27 = vpack.c.bf16 %v1540_v5, %v1508_v19  ;;  %v1642_v28 = vpack.c.bf16 %v1542_v14, %v1510_v23 }
 0x15f   : > { %v1014_v42 = vadd.f32 %v1013_v40, %v4978_v31  ;;  %v1067_v48 = vadd.f32 %v1066_v43, %v4978_v31  ;;  %v1572_v61 = vmax.f32 %v1012_v41, 0.0  ;;  %v1574_v8 = vmax.f32 %v1065_v47, 0.0 }
 0x160   : > { %4168 = vmatmul.mubr.msk.bf16.vlgmr.msra.gmra.mxu0 %vm1725_vm3, %v5003_v39  ;;  %v1015_v49 = vpop.f32.mrf.mxu0  ;;  %4170 = vmatmul.mubr.msk.bf16.vlgmr.msra.gmra.mxu1 %vm1725_vm3, %v5003_v39  ;;  %v1068_v53 = vpop.f32.mrf.mxu1 }
 0x161   : > { %v1016_v52 = vadd.f32 %v1015_v49, %v4978_v31  ;;  %1986 = vmatprep.mubr.bf16.mxu0 %v4569_v7  ;;  %v1069_v57 = vadd.f32 %v1068_v53, %v4978_v31  ;;  %2039 = vmatprep.mubr.bf16.mxu1 %v4569_v7  ;;  %v1603_v63 = vmax.f32 %v1014_v42, 0.0  ;;  %v1605_v9 = vmax.f32 %v1067_v48, 0.0 }
 0x162   : > { %v5098_v58 = vpop.f32.mrf.mxu0  ;;  %v5102_v2 = vpop.f32.mrf.mxu1 }
 0x163   : > { %v1604_v0 = vmax.f32 %v1016_v52, 0.0  ;;  %v1606_v10 = vmax.f32 %v1069_v57, 0.0  ;;  %v1671_v25 = vpack.c.bf16 %v1603_v63, %v1571_v15  ;;  %v1673_v62 = vpack.c.bf16 %v1605_v9, %v1573_v20 }
 0x164   : > { %v1107_v12 = vpop.f32.mrf.mxu0  ;;  %v1160_v16 = vpop.f32.mrf.mxu1  ;;  %v1106_v14 = vadd.f32 %v5098_v58, %v4976_v37  ;;  %v1159_v19 = vadd.f32 %v5102_v2, %v4976_v37 }
 0x165   : > { %v1672_v17 = vpack.c.bf16 %v1604_v0, %v1572_v61  ;;  %v1674_v22 = vpack.c.bf16 %v1606_v10, %v1574_v8  ;;  %v1108_v43 = vadd.f32 %v1107_v12, %v4976_v37  ;;  %v1161_v53 = vadd.f32 %v1160_v16, %v4976_v37 }
 0x166   : > { %v1109_v21 = vpop.f32.mrf.mxu0  ;;  %v1162_v26 = vpop.f32.mrf.mxu1  ;;  %v1511_v3 = vmax.f32 %v1106_v14, 0.0 }
 0x167   : > { %2062 = vmatprep.subr.bf16.mxu0 %v1672_v17  ;;  %2115 = vmatprep.subr.bf16.mxu1 %v1674_v22  ;;  %v1110_v54 = vadd.f32 %v1109_v21, %v4980_v44  ;;  %v1163_v60 = vadd.f32 %v1162_v26, %v4980_v44  ;;  %v1512_v20 = vmax.f32 %v1108_v43, 0.0  ;;  %v1514_v24 = vmax.f32 %v1161_v53, 0.0 }
 0x168   : > { %4169 = vmatmul.mubr.msk.bf16.gmra.mxu0 %vm1725_vm3, %v5035_v4  ;;  %v1111_v59 = vpop.f32.mrf.mxu0  ;;  %4171 = vmatmul.mubr.msk.bf16.gmra.mxu1 %vm1725_vm3, %v5035_v4  ;;  %v1164_v1 = vpop.f32.mrf.mxu1 }
 0x169   : > { %2063 = vmatpush1.bf16.msra.mxu0 %v1671_v25  ;;  %2116 = vmatpush1.bf16.msra.mxu1 %v1673_v62  ;;  %v1112_v45 = vadd.f32 %v1111_v59, %v4980_v44  ;;  %v1165_v49 = vadd.f32 %v1164_v1, %v4980_v44  ;;  %v1543_v25 = vmax.f32 %v1110_v54, 0.0  ;;  %v1545_v62 = vmax.f32 %v1163_v60, 0.0 }
 0x16a   : > { %2064 = vmatprep.subr.bf16.mxu0 %v1640_v27  ;;  %v1115_v30 = vpop.f32.mrf.mxu0  ;;  %2117 = vmatprep.subr.bf16.mxu1 %v1642_v28  ;;  %v1168_v33 = vpop.f32.mrf.mxu1  ;;  %v1513_v28 = vmax.f32 %v1159_v19, 0.0 }
 0x16b   : > { %2082 = vmatprep.mubr.bf16.mxu0 %v4569_v7  ;;  %2135 = vmatprep.mubr.bf16.mxu1 %v4569_v7  ;;  %v1116_v50 = vadd.f32 %v1115_v30, %v4974_v11  ;;  %v1169_v55 = vadd.f32 %v1168_v33, %v4974_v11  ;;  %v1544_v8 = vmax.f32 %v1112_v45, 0.0  ;;  %v1546_v15 = vmax.f32 %v1165_v49, 0.0 }
 0x16c   : > { %v1117_v35 = vpop.f32.mrf.mxu0  ;;  %v1170_v36 = vpop.f32.mrf.mxu1  ;;  %v1643_v30 = vpack.c.bf16 %v1543_v25, %v1511_v3  ;;  %v1645_v33 = vpack.c.bf16 %v1545_v62, %v1513_v28 }
 0x16d   : > { %2065 = vmatpush1.bf16.msra.mxu0 %v1639_v32  ;;  %2118 = vmatpush1.bf16.msra.mxu1 %v1641_v34  ;;  %v1118_v40 = vadd.f32 %v1117_v35, %v4974_v11  ;;  %v1171_v46 = vadd.f32 %v1170_v36, %v4974_v11  ;;  %v1575_v16 = vmax.f32 %v1116_v50, 0.0  ;;  %v1577_v21 = vmax.f32 %v1169_v55, 0.0 }
 0x16e   : > { %v1119_v38 = vpop.f32.mrf.mxu0  ;;  %v1172_v42 = vpop.f32.mrf.mxu1  ;;  %v1644_v59 = vpack.c.bf16 %v1544_v8, %v1512_v20  ;;  %v1646_v1 = vpack.c.bf16 %v1546_v15, %v1514_v24 }
 0x16f   : > { %v1120_v41 = vadd.f32 %v1119_v38, %v4978_v31  ;;  %v1173_v47 = vadd.f32 %v1172_v42, %v4978_v31  ;;  %v1576_v61 = vmax.f32 %v1118_v40, 0.0  ;;  %v1578_v9 = vmax.f32 %v1171_v46, 0.0 }
 0x170   : > { %4172 = vmatmul.mubr.msk.bf16.vlgmr.msra.gmra.mxu0 %vm1725_vm3, %v5003_v39  ;;  %v1121_v48 = vpop.f32.mrf.mxu0  ;;  %4174 = vmatmul.mubr.msk.bf16.vlgmr.msra.gmra.mxu1 %vm1725_vm3, %v5003_v39  ;;  %v1174_v52 = vpop.f32.mrf.mxu1 }
 0x171   : > { %v1122_v51 = vadd.f32 %v1121_v48, %v4978_v31  ;;  %2092 = vmatprep.mubr.bf16.mxu0 %v4569_v7  ;;  %v1175_v56 = vadd.f32 %v1174_v52, %v4978_v31  ;;  %2145 = vmatprep.mubr.bf16.mxu1 %v4569_v7  ;;  %v1607_v63 = vmax.f32 %v1120_v41, 0.0  ;;  %v1609_v10 = vmax.f32 %v1173_v47, 0.0 }
 0x172   : > { %v5132_v57 = vpop.f32.mrf.mxu0  ;;  %v5136_v5 = vpop.f32.mrf.mxu1 }
 0x173   : > { %v1608_v0 = vmax.f32 %v1122_v51, 0.0  ;;  %v1610_v12 = vmax.f32 %v1175_v56, 0.0  ;;  %v1675_v26 = vpack.c.bf16 %v1607_v63, %v1575_v16  ;;  %v1677_v27 = vpack.c.bf16 %v1609_v10, %v1577_v21 }
 0x174   : > { %v1213_v13 = vpop.f32.mrf.mxu0  ;;  %v1266_v18 = vpop.f32.mrf.mxu1  ;;  %v1212_v15 = vadd.f32 %v5132_v57, %v4976_v37  ;;  %v1265_v20 = vadd.f32 %v5136_v5, %v4976_v37 }
 0x175   : > { %v1676_v17 = vpack.c.bf16 %v1608_v0, %v1576_v61  ;;  %v1678_v22 = vpack.c.bf16 %v1610_v12, %v1578_v9  ;;  %v1214_v42 = vadd.f32 %v1213_v13, %v4976_v37  ;;  %v1267_v52 = vadd.f32 %v1266_v18, %v4976_v37 }
 0x176   : > { %v1215_v23 = vpop.f32.mrf.mxu0  ;;  %v1268_v6 = vpop.f32.mrf.mxu1  ;;  %v1515_v3 = vmax.f32 %v1212_v15, 0.0 }
 0x177   : > { %2168 = vmatprep.subr.bf16.mxu0 %v1676_v17  ;;  %2221 = vmatprep.subr.bf16.mxu1 %v1678_v22  ;;  %v1216_v53 = vadd.f32 %v1215_v23, %v4980_v44  ;;  %v1269_v60 = vadd.f32 %v1268_v6, %v4980_v44  ;;  %v1516_v21 = vmax.f32 %v1214_v42, 0.0  ;;  %v1518_v25 = vmax.f32 %v1267_v52, 0.0 }
 0x178   : > { %4173 = vmatmul.mubr.msk.bf16.gmra.mxu0 %vm1725_vm3, %v5035_v4  ;;  %v1217_v58 = vpop.f32.mrf.mxu0  ;;  %4175 = vmatmul.mubr.msk.bf16.gmra.mxu1 %vm1725_vm3, %v5035_v4  ;;  %v1270_v2 = vpop.f32.mrf.mxu1 }
 0x179   : > { %2169 = vmatpush1.bf16.msra.mxu0 %v1675_v26  ;;  %2222 = vmatpush1.bf16.msra.mxu1 %v1677_v27  ;;  %v1218_v43 = vadd.f32 %v1217_v58, %v4980_v44  ;;  %v1271_v48 = vadd.f32 %v1270_v2, %v4980_v44  ;;  %v1547_v26 = vmax.f32 %v1216_v53, 0.0  ;;  %v1517_v2 = vmax.f32 %v1265_v20, 0.0 }
 0x17a   : > { %2170 = vmatprep.subr.bf16.mxu0 %v1644_v59  ;;  %v1221_v29 = vpop.f32.mrf.mxu0  ;;  %2223 = vmatprep.subr.bf16.mxu1 %v1646_v1  ;;  %v1274_v32 = vpop.f32.mrf.mxu1  ;;  %v1549_v59 = vmax.f32 %v1269_v60, 0.0 }
 0x17b   : > { %2188 = vmatprep.mubr.bf16.mxu0 %v4569_v7  ;;  %2241 = vmatprep.mubr.bf16.mxu1 %v4569_v7  ;;  %v1222_v49 = vadd.f32 %v1221_v29, %v4974_v11  ;;  %v1275_v54 = vadd.f32 %v1274_v32, %v4974_v11  ;;  %v1548_v9 = vmax.f32 %v1218_v43, 0.0  ;;  %v1550_v16 = vmax.f32 %v1271_v48, 0.0 }
 0x17c   : > { %v1223_v34 = vpop.f32.mrf.mxu0  ;;  %v1276_v35 = vpop.f32.mrf.mxu1  ;;  %v1647_v29 = vpack.c.bf16 %v1547_v26, %v1515_v3  ;;  %v1649_v32 = vpack.c.bf16 %v1549_v59, %v1517_v2 }
 0x17d   : > { %2171 = vmatpush1.bf16.msra.mxu0 %v1643_v30  ;;  %2224 = vmatpush1.bf16.msra.mxu1 %v1645_v33  ;;  %v1224_v38 = vadd.f32 %v1223_v34, %v4974_v11  ;;  %v1277_v45 = vadd.f32 %v1276_v35, %v4974_v11  ;;  %v1579_v17 = vmax.f32 %v1222_v49, 0.0  ;;  %v1581_v22 = vmax.f32 %v1275_v54, 0.0 }
 0x17e   : > { %v1225_v36 = vpop.f32.mrf.mxu0  ;;  %v1278_v41 = vpop.f32.mrf.mxu1  ;;  %v1648_v27 = vpack.c.bf16 %v1548_v9, %v1516_v21  ;;  %v1650_v1 = vpack.c.bf16 %v1550_v16, %v1518_v25 }
 0x17f   : > { %v1226_v40 = vadd.f32 %v1225_v36, %v4978_v31  ;;  %v1279_v46 = vadd.f32 %v1278_v41, %v4978_v31  ;;  %v1580_v61 = vmax.f32 %v1224_v38, 0.0  ;;  %v1582_v10 = vmax.f32 %v1277_v45, 0.0 }
 0x180   : > { %4176 = vmatmul.mubr.msk.bf16.vlgmr.msra.gmra.mxu0 %vm1725_vm3, %v5003_v39  ;;  %v1227_v47 = vpop.f32.mrf.mxu0  ;;  %4178 = vmatmul.mubr.msk.bf16.vlgmr.msra.gmra.mxu1 %vm1725_vm3, %v5003_v39  ;;  %v1280_v51 = vpop.f32.mrf.mxu1 }
 0x181   : > { %v1228_v50 = vadd.f32 %v1227_v47, %v4978_v31  ;;  %2198 = vmatprep.mubr.bf16.mxu0 %v4569_v7  ;;  %v1281_v55 = vadd.f32 %v1280_v51, %v4978_v31  ;;  %2251 = vmatprep.mubr.bf16.mxu1 %v4569_v7  ;;  %v1611_v63 = vmax.f32 %v1226_v40, 0.0  ;;  %v1613_v12 = vmax.f32 %v1279_v46, 0.0 }
 0x182   : > { %v5166_v56 = vpop.f32.mrf.mxu0  ;;  %v5170_v8 = vpop.f32.mrf.mxu1 }
 0x183   : > { %v1612_v0 = vmax.f32 %v1228_v50, 0.0  ;;  %v1614_v13 = vmax.f32 %v1281_v55, 0.0  ;;  %v1679_v6 = vpack.c.bf16 %v1611_v63, %v1579_v17  ;;  %v1681_v58 = vpack.c.bf16 %v1613_v12, %v1581_v22 }
 0x184   : > { %v1319_v14 = vpop.f32.mrf.mxu0  ;;  %v1372_v19 = vpop.f32.mrf.mxu1  ;;  %v1318_v16 = vadd.f32 %v5166_v56, %v4976_v37  ;;  %v1371_v21 = vadd.f32 %v5170_v8, %v4976_v37 }
 0x185   : > { %v1680_v18 = vpack.c.bf16 %v1612_v0, %v1580_v61  ;;  %v1682_v23 = vpack.c.bf16 %v1614_v13, %v1582_v10  ;;  %v1320_v41 = vadd.f32 %v1319_v14, %v4976_v37  ;;  %v1373_v51 = vadd.f32 %v1372_v19, %v4976_v37 }
 0x186   : > { %v1321_v24 = vpop.f32.mrf.mxu0  ;;  %v1374_v62 = vpop.f32.mrf.mxu1  ;;  %v1519_v3 = vmax.f32 %v1318_v16, 0.0 }
 0x187   : > { %2274 = vmatprep.subr.bf16.mxu0 %v1680_v18  ;;  %2327 = vmatprep.subr.bf16.mxu1 %v1682_v23  ;;  %v1322_v52 = vadd.f32 %v1321_v24, %v4980_v44  ;;  %v1375_v60 = vadd.f32 %v1374_v62, %v4980_v44  ;;  %v1520_v22 = vmax.f32 %v1320_v41, 0.0  ;;  %v1522_v26 = vmax.f32 %v1373_v51, 0.0 }
 0x188   : > { %4177 = vmatmul.mubr.msk.bf16.gmra.mxu0 %vm1725_vm3, %v5035_v4  ;;  %v1323_v57 = vpop.f32.mrf.mxu0  ;;  %4179 = vmatmul.mubr.msk.bf16.gmra.mxu1 %vm1725_vm3, %v5035_v4  ;;  %v1376_v5 = vpop.f32.mrf.mxu1 }
 0x189   : > { %2275 = vmatpush1.bf16.msra.mxu0 %v1679_v6  ;;  %2328 = vmatpush1.bf16.msra.mxu1 %v1681_v58  ;;  %v1324_v42 = vadd.f32 %v1323_v57, %v4980_v44  ;;  %v1377_v47 = vadd.f32 %v1376_v5, %v4980_v44  ;;  %v1551_v6 = vmax.f32 %v1322_v52, 0.0  ;;  %v1521_v5 = vmax.f32 %v1371_v21, 0.0 }
 0x18a   : > { %2276 = vmatprep.subr.bf16.mxu0 %v1648_v27  ;;  %v1327_v28 = vpop.f32.mrf.mxu0  ;;  %2329 = vmatprep.subr.bf16.mxu1 %v1650_v1  ;;  %v1380_v30 = vpop.f32.mrf.mxu1  ;;  %v1553_v27 = vmax.f32 %v1375_v60, 0.0 }
 0x18b   : > { %2294 = vmatprep.mubr.bf16.mxu0 %v4569_v7  ;;  %2347 = vmatprep.mubr.bf16.mxu1 %v4569_v7  ;;  %v1328_v48 = vadd.f32 %v1327_v28, %v4974_v11  ;;  %v1381_v53 = vadd.f32 %v1380_v30, %v4974_v11  ;;  %v1552_v10 = vmax.f32 %v1324_v42, 0.0  ;;  %v1554_v17 = vmax.f32 %v1377_v47, 0.0 }
 0x18c   : > { %v1329_v33 = vpop.f32.mrf.mxu0  ;;  %v1382_v34 = vpop.f32.mrf.mxu1  ;;  %v1651_v28 = vpack.c.bf16 %v1551_v6, %v1519_v3  ;;  %v1653_v30 = vpack.c.bf16 %v1553_v27, %v1521_v5  ;;  %v5249_v27 = vld [vmem:[%s4763_s6] sm:$0xff] }
 0x18d   : > { %2277 = vmatpush1.bf16.msra.mxu0 %v1647_v29  ;;  %2330 = vmatpush1.bf16.msra.mxu1 %v1649_v32  ;;  %v1330_v36 = vadd.f32 %v1329_v33, %v4974_v11  ;;  %v1383_v43 = vadd.f32 %v1382_v34, %v4974_v11  ;;  %v1583_v18 = vmax.f32 %v1328_v48, 0.0  ;;  %v1585_v23 = vmax.f32 %v1381_v53, 0.0 }
 0x18e   : > { %v1331_v35 = vpop.f32.mrf.mxu0  ;;  %v1384_v40 = vpop.f32.mrf.mxu1  ;;  %v1652_v58 = vpack.c.bf16 %v1552_v10, %v1520_v22  ;;  %v1654_v1 = vpack.c.bf16 %v1554_v17, %v1522_v26 }
 0x18f   : > { %v1332_v38 = vadd.f32 %v1331_v35, %v4978_v31  ;;  %v1385_v45 = vadd.f32 %v1384_v40, %v4978_v31  ;;  %v1584_v61 = vmax.f32 %v1330_v36, 0.0  ;;  %v1586_v12 = vmax.f32 %v1383_v43, 0.0 }
 0x190   : > { %4180 = vmatmul.mubr.msk.bf16.vlgmr.msra.gmra.mxu0 %vm1725_vm3, %v5003_v39  ;;  %v1333_v46 = vpop.f32.mrf.mxu0  ;;  %4182 = vmatmul.mubr.msk.bf16.vlgmr.msra.gmra.mxu1 %vm1725_vm3, %v5003_v39  ;;  %v1386_v50 = vpop.f32.mrf.mxu1 }
 0x191   : > { %v1334_v49 = vadd.f32 %v1333_v46, %v4978_v31  ;;  %2304 = vmatprep.mubr.bf16.mxu0 %v4569_v7  ;;  %v1387_v54 = vadd.f32 %v1386_v50, %v4978_v31  ;;  %2357 = vmatprep.mubr.bf16.mxu1 %v4569_v7  ;;  %v1615_v63 = vmax.f32 %v1332_v38, 0.0  ;;  %v1617_v13 = vmax.f32 %v1385_v45, 0.0 }
 0x192   : > { %v1423_v55 = vpop.f32.mrf.mxu0  ;;  %v5202_v9 = vpop.f32.mrf.mxu1 }
 0x193   : > { %v1616_v0 = vmax.f32 %v1334_v49, 0.0  ;;  %v1618_v14 = vmax.f32 %v1387_v54, 0.0  ;;  %v1683_v62 = vpack.c.bf16 %v1615_v63, %v1583_v18  ;;  %v1685_v57 = vpack.c.bf16 %v1617_v13, %v1585_v23 }
 0x194   : > { %v1425_v15 = vpop.f32.mrf.mxu0  ;;  %v1478_v20 = vpop.f32.mrf.mxu1  ;;  %v1424_v35 = vadd.f32 %v1423_v55, %v4976_v37 }
 0x195   : > { %v1684_v19 = vpack.c.bf16 %v1616_v0, %v1584_v61  ;;  %v1686_v24 = vpack.c.bf16 %v1618_v14, %v1586_v12  ;;  %v1426_v41 = vadd.f32 %v1425_v15, %v4976_v37  ;;  %v1479_v51 = vadd.f32 %v1478_v20, %v4976_v37 }
 0x196   : > { %v1427_v25 = vpop.f32.mrf.mxu0  ;;  %v1480_v59 = vpop.f32.mrf.mxu1  ;;  %v1477_v14 = vadd.f32 %v5202_v9, %v4976_v37 }
 0x197   : > { %2380 = vmatprep.subr.bf16.mxu0 %v1684_v19  ;;  %2433 = vmatprep.subr.bf16.mxu1 %v1686_v24  ;;  %v1428_v52 = vadd.f32 %v1427_v25, %v4980_v44  ;;  %v1481_v55 = vadd.f32 %v1480_v59, %v4980_v44  ;;  %v2580_v19 = vlaneseq  ;;  %v1526_v20 = vmax.f32 %v1479_v51, 0.0 }
 0x198   : > { %4181 = vmatmul.mubr.msk.bf16.gmra.mxu0 %vm1725_vm3, %v5035_v4  ;;  %v1429_v56 = vpop.f32.mrf.mxu0  ;;  %4183 = vmatmul.mubr.msk.bf16.gmra.mxu1 %vm1725_vm3, %v5035_v4  ;;  %v1482_v8 = vpop.f32.mrf.mxu1  ;;  %v1523_v25 = vmax.f32 %v1424_v35, 0.0  ;;  %v1525_v9 = vmax.f32 %v1477_v14, 0.0 }
 0x199   : > { %2381 = vmatpush1.bf16.msra.mxu0 %v1683_v62  ;;  %2434 = vmatpush1.bf16.msra.mxu1 %v1685_v57  ;;  %v1430_v42 = vadd.f32 %v1429_v56, %v4980_v44  ;;  %v1483_v47 = vadd.f32 %v1482_v8, %v4980_v44  ;;  %v1555_v21 = vmax.f32 %v1428_v52, 0.0  ;;  %v1557_v22 = vmax.f32 %v1481_v55, 0.0 }
 0x19a   : > { %2382 = vmatprep.subr.bf16.mxu0 %v1652_v58  ;;  %v1433_v2 = vpop.f32.mrf.mxu0  ;;  %2435 = vmatprep.subr.bf16.mxu1 %v1654_v1  ;;  %v1486_v29 = vpop.f32.mrf.mxu1  ;;  %v5241_v26 = vshrl.u32 %v2580_v19, 7 }
 0x19b   : > { %2400 = vmatprep.mubr.bf16.mxu0 %v4569_v7  ;;  %2453 = vmatprep.mubr.bf16.mxu1 %v4569_v7  ;;  %v1434_v48 = vadd.f32 %v1433_v2, %v4974_v11  ;;  %v1487_v53 = vadd.f32 %v1486_v29, %v4974_v11  ;;  %v1556_v0 = vmax.f32 %v1430_v42, 0.0  ;;  %v1558_v15 = vmax.f32 %v1483_v47, 0.0  ;;  %v5279_v42 = vpop.permute.xlu1 %1707 }
 0x19c   : > { %v1435_v32 = vpop.f32.mrf.mxu0  ;;  %v1488_v33 = vpop.f32.mrf.mxu1  ;;  %v1655_v6 = vpack.c.bf16 %v1555_v21, %v1523_v25  ;;  %v1657_v62 = vpack.c.bf16 %v1557_v22, %v1525_v9  ;;  %v5246_v59 = vsub.s32 1, %v5241_v26  ;;  %v5252_v58 = vsub.s32 3, %v5241_v26 }
 0x19d   : > { %2383 = vmatpush1.bf16.msra.mxu0 %v1651_v28  ;;  %2436 = vmatpush1.bf16.msra.mxu1 %v1653_v30  ;;  %v1436_v36 = vadd.f32 %v1435_v32, %v4974_v11  ;;  %v1489_v43 = vadd.f32 %v1488_v33, %v4974_v11  ;;  %v1587_v16 = vmax.f32 %v1434_v48, 0.0  ;;  %v1524_v11 = vmax.f32 %v1426_v41, 0.0 }
 0x19e   : > { %v1437_v34 = vpop.f32.mrf.mxu0  ;;  %v1490_v40 = vpop.f32.mrf.mxu1  ;;  %v1589_v18 = vmax.f32 %v1487_v53, 0.0  ;;  %v1658_v37 = vpack.c.bf16 %v1558_v15, %v1526_v20  ;;  %v2593_v57 = vrot.slane %v5249_v27, %v5246_v59  ;;  %v2601_v56 = vrot.slane %v5249_v27, %v5252_v58 }
 0x19f   : > { %v1438_v38 = vadd.f32 %v1437_v34, %v4978_v31  ;;  %v1491_v45 = vadd.f32 %v1490_v40, %v4978_v31  ;;  %v1588_v60 = vmax.f32 %v1436_v36, 0.0  ;;  %v1590_v10 = vmax.f32 %v1489_v43, 0.0  ;;  %v5276_v36 = vpop.permute.xlu0 %1712  ;;  %v5307_v14 = vpop.permute.xlu1 %1697 }
 0x1a0   : > { %4184 = vmatmul.mubr.msk.bf16.vlgmr.msra.gmra.mxu0 %vm1725_vm3, %v5003_v39  ;;  %v1439_v46 = vpop.f32.mrf.mxu0  ;;  %4186 = vmatmul.mubr.msk.bf16.vlgmr.msra.gmra.mxu1 %vm1725_vm3, %v5003_v39  ;;  %v1492_v50 = vpop.f32.mrf.mxu1  ;;  %v1656_v23 = vpack.c.bf16 %v1556_v0, %v1524_v11  ;;  %vm2715_vm4 = vcmp.eq.s32.totalorder %v5241_v26, %v2593_v57  ;;  %vm2717_vm5 = vcmp.eq.s32.totalorder %v5241_v26, %v2601_v56  ;;  %v5319_v21 = vsub.s32 5, %v5241_v26 }
 0x1a1   : > { %v1440_v49 = vadd.f32 %v1439_v46, %v4978_v31  ;;  %2410 = vmatprep.mubr.bf16.mxu0 %v4569_v7  ;;  %v1493_v54 = vadd.f32 %v1492_v50, %v4978_v31  ;;  %2463 = vmatprep.mubr.bf16.mxu1 %v4569_v7  ;;  %v1619_v61 = vmax.f32 %v1438_v38, 0.0  ;;  %v1621_v12 = vmax.f32 %v1491_v45, 0.0 }
 0x1a3   : > { %v1620_v63 = vmax.f32 %v1440_v49, 0.0  ;;  %v1622_v13 = vmax.f32 %v1493_v54, 0.0  ;;  %v1687_v44 = vpack.c.bf16 %v1619_v61, %v1587_v16  ;;  %v1689_v24 = vpack.c.bf16 %v1621_v12, %v1589_v18  ;;  %v5294_v53 = vpop.permute.xlu0 %1702 }
 0x1a4   : > { %v5311_v16 = vsub.s32 2, %v5241_v26 }
 0x1a5   : > { %v1688_v17 = vpack.c.bf16 %v1620_v63, %v1588_v60  ;;  %v1690_v31 = vpack.c.bf16 %v1622_v13, %v1590_v10  ;;  %v5305_v10 = vsub.s32 0, %v5241_v26 }
 0x1a6   : > { %v2597_v25 = vrot.slane %v5249_v27, %v5311_v16 }
 0x1a7   : > { %2486 = vmatprep.subr.bf16.mxu0 %v1688_v17  ;;  %2539 = vmatprep.subr.bf16.mxu1 %v1690_v31  ;;  %v2589_v20 = vrot.slane %v5249_v27, %v5305_v10 }
 0x1a8   : > { %4185 = vmatmul.mubr.msk.bf16.gmra.mxu0 %vm1725_vm3, %v5035_v4  ;;  %4187 = vmatmul.mubr.msk.bf16.gmra.mxu1 %vm1725_vm3, %v5035_v4  ;;  %vm2716_vm7 = vcmp.eq.s32.totalorder %v5241_v26, %v2597_v25 }
 0x1a9   : > { %2487 = vmatpush1.bf16.msra.mxu0 %v1687_v44  ;;  %2540 = vmatpush1.bf16.msra.mxu1 %v1689_v24  ;;  %vm2714_vm6 = vcmp.eq.s32.totalorder %v5241_v26, %v2589_v20 }
 0x1aa   : > { %2488 = vmatprep.subr.bf16.mxu0 %v1656_v23  ;;  %2541 = vmatprep.subr.bf16.mxu1 %v1658_v37  ;;  %v5322_v23 = vsub.s32 7, %v5241_v26 }
 0x1ab   : > { %2506 = vmatprep.mubr.bf16.mxu0 %v4569_v7  ;;  %2559 = vmatprep.mubr.bf16.mxu1 %v4569_v7 }
 0x1ad   : > { %2489 = vmatpush1.bf16.msra.mxu0 %v1655_v6  ;;  %2542 = vmatpush1.bf16.msra.mxu1 %v1657_v62  ;;  %v2609_v62 = vrot.slane %v5249_v27, %v5319_v21 }
 0x1af   : > { %vm2719_vm8 = vcmp.eq.s32.totalorder %v5241_v26, %v2609_v62 }
 0x1b0   : > { %4188 = vmatmul.mubr.msk.bf16.vlgmr.msra.gmra.mxu0 %vm1725_vm3, %v5003_v39  ;;  %4190 = vmatmul.mubr.msk.bf16.vlgmr.msra.gmra.mxu1 %vm1725_vm3, %v5003_v39  ;;  %v4570_v39 = vmov 1.0  }
 0x1b1   : > { %2516 = vmatprep.mubr.bf16.mxu0 %v4569_v7  ;;  %2569 = vmatprep.mubr.bf16.mxu1 %v4569_v7 }
 0x1b8   : > { %4189 = vmatmul.mubr.msk.bf16.gmra.mxu0 %vm1725_vm3, %v5035_v4  ;;  %4191 = vmatmul.mubr.msk.bf16.gmra.mxu1 %vm1725_vm3, %v5035_v4 }
 0x1b9   : > { %4224 = vmatprep.mubr.msk.f32.mxu0 %vm2715_vm4, %v4570_v39  ;;  %4226 = vmatprep.mubr.msk.f32.mxu1 %vm2717_vm5, %v4570_v39 }
 0x1ff   : > { %v5272_v7 = vpop.f32.mrf.mxu0  ;;  %v5274_v3 = vpop.f32.mrf.mxu1 }
 0x200   : > { %v1767_v24 = vadd.f32 %v5272_v7, %v5307_v14  ;;  %v1820_v37 = vadd.f32 %v5274_v3, %v5307_v14  ;;  %v2617_v7 = vrot.slane %v5249_v27, %v5322_v23 }
 0x201   : > { %v1768_v1 = vpop.f32.mrf.mxu0  ;;  %v1821_v8 = vpop.f32.mrf.mxu1 }
 0x202   : > { %v1769_v17 = vadd.f32 %v1768_v1, %v5307_v14  ;;  %v1822_v19 = vadd.f32 %v1821_v8, %v5307_v14  ;;  %vm2721_vm9 = vcmp.eq.s32.totalorder %v5241_v26, %v2617_v7 }
 0x203   : > { %v1770_v5 = vpop.f32.mrf.mxu0  ;;  %v1823_v2 = vpop.f32.mrf.mxu1 }
 0x204   : > { %v1771_v15 = vadd.f32 %v1770_v5, %v5294_v53  ;;  %v1824_v11 = vadd.f32 %v1823_v2, %v5294_v53 }
 0x205   : > { %v1772_v28 = vpop.f32.mrf.mxu0  ;;  %v1825_v29 = vpop.f32.mrf.mxu1 }
 0x206   : > { %v1773_v55 = vadd.f32 %v1772_v28, %v5294_v53  ;;  %v1826_v0 = vadd.f32 %v1825_v29, %v5294_v53 }
 0x207   : > { %v1776_v30 = vpop.f32.mrf.mxu0 }
 0x208   : > { %v1829_v32 = vpop.f32.mrf.mxu1  ;;  %v1777_v54 = vadd.f32 %v1776_v30, %v5279_v42 }
 0x209   : > { %v1778_v33 = vpop.f32.mrf.mxu0  ;;  %v1830_v60 = vadd.f32 %v1829_v32, %v5279_v42 }
 0x20a   : > { %v1831_v34 = vpop.f32.mrf.mxu1  ;;  %v1779_v46 = vadd.f32 %v1778_v33, %v5279_v42 }
 0x20b   : > { %v1780_v4 = vpop.f32.mrf.mxu0  ;;  %v1832_v50 = vadd.f32 %v1831_v34, %v5279_v42 }
 0x20c   : > { %v1833_v35 = vpop.f32.mrf.mxu1  ;;  %v1781_v43 = vadd.f32 %v1780_v4, %v5276_v36 }
 0x20d   : > { %v1782_v38 = vpop.f32.mrf.mxu0  ;;  %v1834_v47 = vadd.f32 %v1833_v35, %v5276_v36 }
 0x20e   : > { %v1783_v40 = vadd.f32 %v1782_v38, %v5276_v36  ;;  %v1835_v41 = vpop.f32.mrf.mxu1 }
 0x20f   : > { %v1836_v45 = vadd.f32 %v1835_v41, %v5276_v36 }
 0x210   : > { %v5285_v48 = vpop.f32.mrf.mxu0  ;;  %v5287_v49 = vpop.f32.mrf.mxu1  ;;  %2834 = vmatprep.subr.mxu0 %v1783_v40 }
 0x211   : > { %2904 = vmatprep.subr.mxu1 %v1836_v45  ;;  %2835 = vmatpush1.xpose.msra.mxu0 %v1781_v43  ;;  %v5365_v45 = vsub.s32 4, %v5241_v26 }
 0x212   : > { %v5290_v51 = vpop.f32.mrf.mxu0  ;;  %v5292_v52 = vpop.f32.mrf.mxu1  ;;  %2905 = vmatpush1.xpose.msra.mxu1 %v1834_v47  ;;  %2836 = vmatprep.subr.mxu0 %v1779_v46  ;;  %v5368_v47 = vsub.s32 6, %v5241_v26 }
 0x213   : > { %2906 = vmatprep.subr.mxu1 %v1832_v50 }
 0x214   : > { %v5299_v61 = vpop.f32.mrf.mxu0  ;;  %v5301_v63 = vpop.f32.mrf.mxu1 }
 0x215   : > { %2837 = vmatpush1.xpose.msra.mxu0 %v1777_v54  ;;  %v1877_v50 = vadd.f32 %v5299_v61, %v5294_v53 }
 0x216   : > { %v1878_v12 = vpop.f32.mrf.mxu0  ;;  %v1931_v13 = vpop.f32.mrf.mxu1  ;;  %2907 = vmatpush1.xpose.msra.mxu1 %v1830_v60  ;;  %2838 = vmatprep.subr.mxu0 %v1773_v55  ;;  %v1875_v55 = vadd.f32 %v5290_v51, %v5307_v14  ;;  %v1930_v60 = vadd.f32 %v5301_v63, %v5294_v53  ;;  %v2613_v51 = vrot.slane %v5249_v27, %v5368_v47 }
 0x217   : > { %2908 = vmatprep.subr.mxu1 %v1826_v0  ;;  %v1879_v35 = vadd.f32 %v1878_v12, %v5294_v53  ;;  %v1932_v41 = vadd.f32 %v1931_v13, %v5294_v53  ;;  %v1928_v12 = vadd.f32 %v5292_v52, %v5307_v14  ;;  %v1873_v63 = vadd.f32 %v5285_v48, %v5307_v14 }
 0x218   : > { %v1882_v18 = vpop.f32.mrf.mxu0  ;;  %v1935_v31 = vpop.f32.mrf.mxu1  ;;  %v1926_v52 = vadd.f32 %v5287_v49, %v5307_v14  ;;  %vm2720_vm11 = vcmp.eq.s32.totalorder %v5241_v26, %v2613_v51 }
 0x219   : > { %2839 = vmatpush1.xpose.msra.mxu0 %v1771_v15  ;;  %v1883_v34 = vadd.f32 %v1882_v18, %v5279_v42  ;;  %v1936_v38 = vadd.f32 %v1935_v31, %v5279_v42  ;;  %v2605_v15 = vrot.slane %v5249_v27, %v5365_v45 }
 0x21a   : > { %v1884_v44 = vpop.f32.mrf.mxu0  ;;  %v1937_v22 = vpop.f32.mrf.mxu1  ;;  %2909 = vmatpush1.xpose.msra.mxu1 %v1824_v11  ;;  %2840 = vmatprep.subr.mxu0 %v1769_v17  ;;  %v5381_v17 = vld [vmem:[%s4763_s6 + $0x8] sm:$0xff] }
 0x21b   : > { %2910 = vmatprep.subr.mxu1 %v1822_v19  ;;  %v1885_v2 = vadd.f32 %v1884_v44, %v5279_v42  ;;  %v1938_v30 = vadd.f32 %v1937_v22, %v5279_v42  ;;  %v2625_v31 = vrot.slane %v5381_v17, %v5246_v59  ;;  %vm2718_vm10 = vcmp.eq.s32.totalorder %v5241_v26, %v2605_v15 }
 0x21c   : > { %v1886_v9 = vpop.f32.mrf.mxu0  ;;  %v1939_v6 = vpop.f32.mrf.mxu1  ;;  %v2633_v20 = vrot.slane %v5381_v17, %v5252_v58 }
 0x21d   : > { %2841 = vmatpush1.xpose.msra.mxu0 %v1767_v24  ;;  %v1887_v3 = vadd.f32 %v1886_v9, %v5276_v36  ;;  %v1940_v28 = vadd.f32 %v1939_v6, %v5276_v36  ;;  %vm5405_vm12 = vcmp.eq.s32.totalorder %v5241_v26, %v2625_v31 }
 0x21e   : > { %v1888_v57 = vpop.f32.mrf.mxu0  ;;  %v1941_v56 = vpop.f32.mrf.mxu1  ;;  %2911 = vmatpush1.xpose.msra.mxu1 %v1820_v37  ;;  %vm2725_vm13 = vcmp.eq.s32.totalorder %v5241_v26, %v2633_v20 }
 0x21f   : > { %v1889_v1 = vadd.f32 %v1888_v57, %v5276_v36  ;;  %v1942_v8 = vadd.f32 %v1941_v56, %v5276_v36 }
 0x220   : > { %v5339_v5 = vpop.f32.mrf.mxu0  ;;  %4225 = vmatmul.mubr.msk.f32.vlgmr.msra.gmra.mxu0 %vm2714_vm6, %v4570_v39  ;;  %v5344_v29 = vpop.f32.mrf.mxu1 }
 0x221   : > { %2974 = vmatprep.subr.mxu0 %v1889_v1  ;;  %3044 = vmatprep.subr.mxu1 %v1942_v8 }
 0x222   : > { %v5348_v32 = vpop.f32.mrf.mxu0  ;;  %4227 = vmatmul.mubr.msk.f32.vlgmr.msra.gmra.mxu1 %vm2716_vm7, %v4570_v39  ;;  %2975 = vmatpush1.xpose.msra.mxu0 %v1887_v3  ;;  %v5352_v33 = vpop.f32.mrf.mxu1 }
 0x223   : > { %3045 = vmatpush1.xpose.msra.mxu1 %v1940_v28  ;;  %2976 = vmatprep.subr.mxu0 %v1885_v2 }
 0x224   : > { %3046 = vmatprep.subr.mxu1 %v1938_v30  ;;  %v5355_v4 = vpop.f32.mrf.mxu0  ;;  %4228 = vmatprep.mubr.msk.f32.mxu0 %vm2719_vm8, %v4570_v39  ;;  %v5360_v40 = vpop.f32.mrf.mxu1 }
 0x225   : > { %4230 = vmatprep.mubr.msk.f32.mxu1 %vm2721_vm9, %v4570_v39 }
 0x226   : > { %v1984_v43 = vpop.f32.mrf.mxu0  ;;  %2977 = vmatpush1.xpose.msra.mxu0 %v1883_v34  ;;  %v2037_v46 = vpop.f32.mrf.mxu1 }
 0x227   : > { %3047 = vmatpush1.xpose.msra.mxu1 %v1936_v38  ;;  %2978 = vmatprep.subr.mxu0 %v1879_v35  ;;  %v1985_v3 = vadd.f32 %v1984_v43, %v5294_v53  ;;  %v2038_v2 = vadd.f32 %v2037_v46, %v5294_v53  ;;  %v1983_v35 = vadd.f32 %v5355_v4, %v5294_v53 }
 0x228   : > { %3048 = vmatprep.subr.mxu1 %v1932_v41  ;;  %v1988_v54 = vpop.f32.mrf.mxu0  ;;  %v2041_v0 = vpop.f32.mrf.mxu1  ;;  %v2036_v38 = vadd.f32 %v5360_v40, %v5294_v53  ;;  %v2034_v43 = vadd.f32 %v5352_v33, %v5307_v14  ;;  %v2629_v40 = vrot.slane %v5381_v17, %v5311_v16 }
 0x229   : > { %v1989_v7 = vadd.f32 %v1988_v54, %v5279_v42  ;;  %v2042_v1 = vadd.f32 %v2041_v0, %v5279_v42 }
 0x22a   : > { %v1990_v13 = vpop.f32.mrf.mxu0  ;;  %2979 = vmatpush1.xpose.msra.mxu0 %v1877_v50  ;;  %v2043_v61 = vpop.f32.mrf.mxu1  ;;  %v1981_v50 = vadd.f32 %v5348_v32, %v5307_v14  ;;  %v2032_v32 = vadd.f32 %v5344_v29, %v5307_v14  ;;  %vm2724_vm15 = vcmp.eq.s32.totalorder %v5241_v26, %v2629_v40 }
 0x22b   : > { %3049 = vmatpush1.xpose.msra.mxu1 %v1930_v60  ;;  %2980 = vmatprep.subr.mxu0 %v1875_v55  ;;  %v1991_v9 = vadd.f32 %v1990_v13, %v5279_v42  ;;  %v2044_v6 = vadd.f32 %v2043_v61, %v5279_v42  ;;  %v2621_v55 = vrot.slane %v5381_v17, %v5305_v10 }
 0x22c   : > { %3050 = vmatprep.subr.mxu1 %v1928_v12  ;;  %v1992_v11 = vpop.f32.mrf.mxu0  ;;  %v2045_v18 = vpop.f32.mrf.mxu1  ;;  %v1979_v60 = vadd.f32 %v5339_v5, %v5307_v14  ;;  %v2641_v12 = vrot.slane %v5381_v17, %v5319_v21  ;;  %v2649_v61 = vrot.slane %v5381_v17, %v5322_v23 }
 0x22d   : > { %v1993_v22 = vadd.f32 %v1992_v11, %v5276_v36  ;;  %v2046_v24 = vadd.f32 %v2045_v18, %v5276_v36  ;;  %vm2722_vm14 = vcmp.eq.s32.totalorder %v5241_v26, %v2621_v55 }
 0x22e   : > { %v1994_v19 = vpop.f32.mrf.mxu0  ;;  %2981 = vmatpush1.xpose.msra.mxu0 %v1873_v63  ;;  %v2047_v44 = vpop.f32.mrf.mxu1  ;;  %vm2727_vm0 = vcmp.eq.s32.totalorder %v5241_v26, %v2641_v12  ;;  %vm2729_vm1 = vcmp.eq.s32.totalorder %v5241_v26, %v2649_v61 }
 0x22f   : > { %v1995_v27 = vadd.f32 %v1994_v19, %v5276_v36  ;;  %3051 = vmatpush1.xpose.msra.mxu1 %v1926_v52  ;;  %v2048_v48 = vadd.f32 %v2047_v44, %v5276_v36 }
 0x230   : > { %v5397_v49 = vpop.f32.mrf.mxu0  ;;  %v5401_v25 = vpop.f32.mrf.mxu1 }
 0x231   : > { %4229 = vmatmul.mubr.msk.f32.vlgmr.msra.gmra.mxu0 %vm2718_vm10, %v4570_v39  ;;  %3114 = vmatprep.subr.mxu0 %v1995_v27 }
 0x232   : > { %3184 = vmatprep.subr.mxu1 %v2048_v48  ;;  %v5411_v62 = vpop.f32.mrf.mxu0  ;;  %4231 = vmatmul.mubr.msk.f32.vlgmr.msra.gmra.mxu1 %vm2720_vm11, %v4570_v39  ;;  %v5415_v57 = vpop.f32.mrf.mxu1 }
 0x233   : > { %3115 = vmatpush1.xpose.msra.mxu0 %v1993_v22  ;;  %3185 = vmatpush1.xpose.msra.mxu1 %v2046_v24 }
 0x234   : > { %3116 = vmatprep.subr.mxu0 %v1991_v9  ;;  %3186 = vmatprep.subr.mxu1 %v2044_v6  ;;  %v5417_v56 = vpop.f32.mrf.mxu0  ;;  %v5421_v8 = vpop.f32.mrf.mxu1 }
 0x235   : > { %4232 = vmatprep.mubr.msk.f32.mxu0 %vm5405_vm12, %v4570_v39  ;;  %4234 = vmatprep.mubr.msk.f32.mxu1 %vm2725_vm13, %v4570_v39 }
 0x236   : > { %v2090_v28 = vpop.f32.mrf.mxu0  ;;  %v2143_v30 = vpop.f32.mrf.mxu1 }
 0x237   : > { %3117 = vmatpush1.xpose.msra.mxu0 %v1989_v7  ;;  %3187 = vmatpush1.xpose.msra.mxu1 %v2042_v1  ;;  %v2091_v48 = vadd.f32 %v2090_v28, %v5294_v53  ;;  %v2144_v37 = vadd.f32 %v2143_v30, %v5294_v53  ;;  %v2089_v7 = vadd.f32 %v5417_v56, %v5294_v53 }
 0x238   : > { %3118 = vmatprep.subr.mxu0 %v1985_v3  ;;  %3188 = vmatprep.subr.mxu1 %v2038_v2  ;;  %v2094_v34 = vpop.f32.mrf.mxu0  ;;  %v2147_v41 = vpop.f32.mrf.mxu1  ;;  %v2087_v3 = vadd.f32 %v5411_v62, %v5307_v14  ;;  %v2142_v2 = vadd.f32 %v5421_v8, %v5294_v53  ;;  %v2140_v30 = vadd.f32 %v5415_v57, %v5307_v14 }
 0x239   : > { %v2095_v27 = vadd.f32 %v2094_v34, %v5279_v42  ;;  %v2148_v22 = vadd.f32 %v2147_v41, %v5279_v42  ;;  %v2645_v62 = vrot.slane %v5381_v17, %v5368_v47  ;;  %v2085_v8 = vadd.f32 %v5397_v49, %v5307_v14 }
 0x23a   : > { %v2096_v46 = vpop.f32.mrf.mxu0  ;;  %v2149_v54 = vpop.f32.mrf.mxu1  ;;  %v2138_v57 = vadd.f32 %v5401_v25, %v5307_v14 }
 0x23b   : > { %3119 = vmatpush1.xpose.msra.mxu0 %v1983_v35  ;;  %3189 = vmatpush1.xpose.msra.mxu1 %v2036_v38  ;;  %v2097_v11 = vadd.f32 %v2096_v46, %v5279_v42  ;;  %v2150_v31 = vadd.f32 %v2149_v54, %v5279_v42  ;;  %v2637_v35 = vrot.slane %v5381_v17, %v5365_v45  ;;  %v5490_v38 = vld [vmem:[%s4763_s6 + $0x10] sm:$0xff] }
 0x23c   : > { %3120 = vmatprep.subr.mxu0 %v1981_v50  ;;  %3190 = vmatprep.subr.mxu1 %v2034_v43  ;;  %v2098_v4 = vpop.f32.mrf.mxu0  ;;  %v2151_v33 = vpop.f32.mrf.mxu1  ;;  %v2657_v43 = vrot.slane %v5490_v38, %v5246_v59  ;;  %v2665_v17 = vrot.slane %v5490_v38, %v5252_v58  ;;  %vm2728_vm4 = vcmp.eq.s32.totalorder %v5241_v26, %v2645_v62 }
 0x23d   : > { %v2099_v29 = vadd.f32 %v2098_v4, %v5276_v36  ;;  %v2152_v52 = vadd.f32 %v2151_v33, %v5276_v36  ;;  %vm2726_vm2 = vcmp.eq.s32.totalorder %v5241_v26, %v2637_v35 }
 0x23e   : > { %v2100_v0 = vpop.f32.mrf.mxu0  ;;  %v2153_v15 = vpop.f32.mrf.mxu1  ;;  %vm2731_vm5 = vcmp.eq.s32.totalorder %v5241_v26, %v2657_v43  ;;  %vm2733_vm6 = vcmp.eq.s32.totalorder %v5241_v26, %v2665_v17 }
 0x23f   : > { %v2101_v13 = vadd.f32 %v2100_v0, %v5276_v36  ;;  %3121 = vmatpush1.xpose.msra.mxu0 %v1979_v60  ;;  %3191 = vmatpush1.xpose.msra.mxu1 %v2032_v32  ;;  %v2154_v5 = vadd.f32 %v2153_v15, %v5276_v36 }
 0x240   : > { %v5452_v51 = vpop.f32.mrf.mxu0  ;;  %v5456_v63 = vpop.f32.mrf.mxu1 }
 0x241   : > { %3254 = vmatprep.subr.mxu0 %v2101_v13  ;;  %3324 = vmatprep.subr.mxu1 %v2154_v5 }
 0x242   : > { %4233 = vmatmul.mubr.msk.f32.vlgmr.msra.gmra.mxu0 %vm2722_vm14, %v4570_v39  ;;  %v5461_v18 = vpop.f32.mrf.mxu0  ;;  %v5465_v19 = vpop.f32.mrf.mxu1  ;;  %4235 = vmatmul.mubr.msk.f32.vlgmr.msra.gmra.mxu1 %vm2724_vm15, %v4570_v39 }
 0x243   : > { %3255 = vmatpush1.xpose.msra.mxu0 %v2099_v29  ;;  %3325 = vmatpush1.xpose.msra.mxu1 %v2152_v52 }
 0x244   : > { %3256 = vmatprep.subr.mxu0 %v2097_v11  ;;  %v5469_v20 = vpop.f32.mrf.mxu0  ;;  %3326 = vmatprep.subr.mxu1 %v2150_v31  ;;  %v5472_v44 = vpop.f32.mrf.mxu1 }
 0x245   : > { %4236 = vmatprep.mubr.msk.f32.mxu0 %vm2727_vm0, %v4570_v39  ;;  %4238 = vmatprep.mubr.msk.f32.mxu1 %vm2729_vm1, %v4570_v39 }
 0x246   : > { %v2196_v24 = vpop.f32.mrf.mxu0  ;;  %v2249_v9 = vpop.f32.mrf.mxu1 }
 0x247   : > { %3257 = vmatpush1.xpose.msra.mxu0 %v2095_v27  ;;  %3327 = vmatpush1.xpose.msra.mxu1 %v2148_v22  ;;  %v2197_v61 = vadd.f32 %v2196_v24, %v5294_v53  ;;  %v2250_v11 = vadd.f32 %v2249_v9, %v5294_v53  ;;  %v2195_v27 = vadd.f32 %v5469_v20, %v5294_v53 }
 0x248   : > { %3258 = vmatprep.subr.mxu0 %v2091_v48  ;;  %v2200_v6 = vpop.f32.mrf.mxu0  ;;  %3328 = vmatprep.subr.mxu1 %v2144_v37  ;;  %v2253_v1 = vpop.f32.mrf.mxu1  ;;  %v2193_v22 = vadd.f32 %v5461_v18, %v5307_v14  ;;  %v2248_v24 = vadd.f32 %v5472_v44, %v5294_v53  ;;  %v2246_v9 = vadd.f32 %v5465_v19, %v5307_v14 }
 0x249   : > { %v2201_v13 = vadd.f32 %v2200_v6, %v5279_v42  ;;  %v2254_v5 = vadd.f32 %v2253_v1, %v5279_v42  ;;  %v2661_v1 = vrot.slane %v5490_v38, %v5311_v16  ;;  %v2191_v18 = vadd.f32 %v5452_v51, %v5307_v14 }
 0x24a   : > { %v2202_v28 = vpop.f32.mrf.mxu0  ;;  %v2255_v34 = vpop.f32.mrf.mxu1 }
 0x24b   : > { %3259 = vmatpush1.xpose.msra.mxu0 %v2089_v7  ;;  %3329 = vmatpush1.xpose.msra.mxu1 %v2142_v2  ;;  %v2203_v40 = vadd.f32 %v2202_v28, %v5279_v42  ;;  %v2256_v33 = vadd.f32 %v2255_v34, %v5279_v42  ;;  %v2653_v7 = vrot.slane %v5490_v38, %v5305_v10 }
 0x24c   : > { %3260 = vmatprep.subr.mxu0 %v2087_v3  ;;  %v2204_v56 = vpop.f32.mrf.mxu0  ;;  %3330 = vmatprep.subr.mxu1 %v2140_v30  ;;  %v2257_v41 = vpop.f32.mrf.mxu1  ;;  %v2244_v3 = vadd.f32 %v5456_v63, %v5307_v14  ;;  %v2673_v2 = vrot.slane %v5490_v38, %v5319_v21  ;;  %v2681_v34 = vrot.slane %v5490_v38, %v5322_v23 }
 0x24d   : > { %v2205_v25 = vadd.f32 %v2204_v56, %v5276_v36  ;;  %v2258_v60 = vadd.f32 %v2257_v41, %v5276_v36  ;;  %vm2730_vm7 = vcmp.eq.s32.totalorder %v5241_v26, %v2653_v7  ;;  %vm2732_vm8 = vcmp.eq.s32.totalorder %v5241_v26, %v2661_v1 }
 0x24e   : > { %v2206_v50 = vpop.f32.mrf.mxu0  ;;  %v2259_v54 = vpop.f32.mrf.mxu1  ;;  %vm2735_vm9 = vcmp.eq.s32.totalorder %v5241_v26, %v2673_v2  ;;  %vm2737_vm10 = vcmp.eq.s32.totalorder %v5241_v26, %v2681_v34 }
 0x24f   : > { %v2207_v46 = vadd.f32 %v2206_v50, %v5276_v36  ;;  %3261 = vmatpush1.xpose.msra.mxu0 %v2085_v8  ;;  %v2260_v49 = vadd.f32 %v2259_v54, %v5276_v36  ;;  %3331 = vmatpush1.xpose.msra.mxu1 %v2138_v57 }
 0x250   : > { %v5505_v55 = vpop.f32.mrf.mxu0  ;;  %v5509_v4 = vpop.f32.mrf.mxu1 }
 0x251   : > { %3394 = vmatprep.subr.mxu0 %v2207_v46  ;;  %3464 = vmatprep.subr.mxu1 %v2260_v49 }
 0x252   : > { %4237 = vmatmul.mubr.msk.f32.vlgmr.msra.gmra.mxu0 %vm2726_vm2, %v4570_v39  ;;  %v5514_v32 = vpop.f32.mrf.mxu0  ;;  %v5518_v0 = vpop.f32.mrf.mxu1  ;;  %4239 = vmatmul.mubr.msk.f32.vlgmr.msra.gmra.mxu1 %vm2728_vm4, %v4570_v39 }
 0x253   : > { %3395 = vmatpush1.xpose.msra.mxu0 %v2205_v25  ;;  %3465 = vmatpush1.xpose.msra.mxu1 %v2258_v60 }
 0x254   : > { %3396 = vmatprep.subr.mxu0 %v2203_v40  ;;  %v5522_v12 = vpop.f32.mrf.mxu0  ;;  %3466 = vmatprep.subr.mxu1 %v2256_v33  ;;  %v5525_v15 = vpop.f32.mrf.mxu1 }
 0x255   : > { %4240 = vmatprep.mubr.msk.f32.mxu0 %vm2731_vm5, %v4570_v39  ;;  %4242 = vmatprep.mubr.msk.f32.mxu1 %vm2733_vm6, %v4570_v39 }
 0x256   : > { %v2302_v29 = vpop.f32.mrf.mxu0  ;;  %v2355_v52 = vpop.f32.mrf.mxu1 }
 0x257   : > { %3397 = vmatpush1.xpose.msra.mxu0 %v2201_v13  ;;  %3467 = vmatpush1.xpose.msra.mxu1 %v2254_v5  ;;  %v2303_v17 = vadd.f32 %v2302_v29, %v5294_v53  ;;  %v2356_v40 = vadd.f32 %v2355_v52, %v5294_v53  ;;  %v2301_v13 = vadd.f32 %v5522_v12, %v5294_v53 }
 0x258   : > { %3398 = vmatprep.subr.mxu0 %v2197_v61  ;;  %v2306_v31 = vpop.f32.mrf.mxu0  ;;  %3468 = vmatprep.subr.mxu1 %v2250_v11  ;;  %v2359_v48 = vpop.f32.mrf.mxu1  ;;  %v2299_v5 = vadd.f32 %v5514_v32, %v5307_v14  ;;  %v2354_v29 = vadd.f32 %v5525_v15, %v5294_v53  ;;  %v2352_v52 = vadd.f32 %v5518_v0, %v5307_v14 }
 0x259   : > { %v2307_v46 = vadd.f32 %v2306_v31, %v5279_v42  ;;  %v2360_v49 = vadd.f32 %v2359_v48, %v5279_v42  ;;  %v5593_v48 = vld [vmem:[%s4763_s6 + $0x18] sm:$0xff]  ;;  %v2677_v32 = vrot.slane %v5490_v38, %v5368_v47  ;;  %v2297_v15 = vadd.f32 %v5505_v55, %v5307_v14  ;;  %s4257_s6 = sshll.u32 %s4549_s28, 7  ;;  %s4441_s28 = sshll.u32 %s4571_s18, 4  ;;  %s4442_s28 = int_to_ptr.vmem [resolvable:$false] %s4441_s28 }
 0x25a   : > { %v2308_v37 = vpop.f32.mrf.mxu0  ;;  %v2361_v6 = vpop.f32.mrf.mxu1  ;;  %v2350_v0 = vadd.f32 %v5509_v4, %v5307_v14  ;;  %s3945_s13 = scalar_lea.hbm %s5790_s10, %s4257_s6  ;;  %s4443_s21 = scalar_lea.vmem %s4442_s28, 256 }
 0x25b   : > { %3399 = vmatpush1.xpose.msra.mxu0 %v2195_v27  ;;  %3469 = vmatpush1.xpose.msra.mxu1 %v2248_v24  ;;  %v2309_v62 = vadd.f32 %v2308_v37, %v5279_v42  ;;  %v2362_v57 = vadd.f32 %v2361_v6, %v5279_v42  ;;  %v2669_v27 = vrot.slane %v5490_v38, %v5365_v45  ;;  %p4444_p8 = scmp.lt.s32.totalorder %s3948_s11, %s4442_s28  ;;  %p4445_p9 = scmp.lt.s32.totalorder %s4443_s21, %s4437_s12 }
 0x25c   : > { %3400 = vmatprep.subr.mxu0 %v2193_v22  ;;  %v2310_v20 = vpop.f32.mrf.mxu0  ;;  %3470 = vmatprep.subr.mxu1 %v2246_v9  ;;  %v2363_v44 = vpop.f32.mrf.mxu1  ;;  %v2689_v37 = vrot.slane %v5593_v48, %v5246_v59  ;;  %v2697_v38 = vrot.slane %v5593_v48, %v5252_v58  ;;  %vm2736_vm12 = vcmp.eq.s32.totalorder %v5241_v26, %v2677_v32 }
 0x25d   : > { %v2311_v63 = vadd.f32 %v2310_v20, %v5276_v36  ;;  %v2364_v8 = vadd.f32 %v2363_v44, %v5276_v36  ;;  %vm2734_vm11 = vcmp.eq.s32.totalorder %v5241_v26, %v2669_v27  ;;  %p4446_p10 = por %p4445_p9, %p4444_p8 }
 0x25e   : > { %v2312_v19 = vpop.f32.mrf.mxu0  ;;  %v2365_v30 = vpop.f32.mrf.mxu1  ;;  %vm2739_vm13 = vcmp.eq.s32.totalorder %v5241_v26, %v2689_v37  ;;  %vm2741_vm14 = vcmp.eq.s32.totalorder %v5241_v26, %v2697_v38 }
 0x25f   : > { %v2313_v28 = vadd.f32 %v2312_v19, %v5276_v36  ;;  %3401 = vmatpush1.xpose.msra.mxu0 %v2191_v18  ;;  %v2366_v51 = vadd.f32 %v2365_v30, %v5276_v36  ;;  %3471 = vmatpush1.xpose.msra.mxu1 %v2244_v3  ;;  %p4447_p5 = pnand %p4446_p10, %p4440_p1 }
 0x260   : > { %v5555_v35 = vpop.f32.mrf.mxu0  ;;  %v5559_v56 = vpop.f32.mrf.mxu1 }
 0x261   : > { %3534 = vmatprep.subr.mxu0 %v2313_v28  ;;  %3604 = vmatprep.subr.mxu1 %v2366_v51 }
 0x262   : > { %4241 = vmatmul.mubr.msk.f32.vlgmr.msra.gmra.mxu0 %vm2730_vm7, %v4570_v39  ;;  %v5564_v41 = vpop.f32.mrf.mxu0  ;;  %v5568_v50 = vpop.f32.mrf.mxu1  ;;  %4243 = vmatmul.mubr.msk.f32.vlgmr.msra.gmra.mxu1 %vm2732_vm8, %v4570_v39 }
 0x263   : > { %3535 = vmatpush1.xpose.msra.mxu0 %v2311_v63  ;;  %3605 = vmatpush1.xpose.msra.mxu1 %v2364_v8 }
 0x264   : > { %3536 = vmatprep.subr.mxu0 %v2309_v62  ;;  %v5572_v43 = vpop.f32.mrf.mxu0  ;;  %3606 = vmatprep.subr.mxu1 %v2362_v57  ;;  %v5575_v54 = vpop.f32.mrf.mxu1 }
 0x265   : > { %4244 = vmatprep.mubr.msk.f32.mxu0 %vm2735_vm9, %v4570_v39  ;;  %4246 = vmatprep.mubr.msk.f32.mxu1 %vm2737_vm10, %v4570_v39  ;;  %v2407_v8 = vadd.f32 %v5572_v43, %v5294_v53 }
 0x266   : > { %v2408_v25 = vpop.f32.mrf.mxu0  ;;  %v2461_v60 = vpop.f32.mrf.mxu1 }
 0x267   : > { %3537 = vmatpush1.xpose.msra.mxu0 %v2307_v46  ;;  %3607 = vmatpush1.xpose.msra.mxu1 %v2360_v49  ;;  %v2409_v28 = vadd.f32 %v2408_v25, %v5294_v53  ;;  %v2462_v51 = vadd.f32 %v2461_v60, %v5294_v53  ;;  %v2405_v46 = vadd.f32 %v5564_v41, %v5307_v14 }
 0x268   : > { %3538 = vmatprep.subr.mxu0 %v2303_v17  ;;  %v2412_v33 = vpop.f32.mrf.mxu0  ;;  %3608 = vmatprep.subr.mxu1 %v2356_v40  ;;  %v2465_v61 = vpop.f32.mrf.mxu1  ;;  %v2460_v17 = vadd.f32 %v5575_v54, %v5294_v53  ;;  %v2458_v25 = vadd.f32 %v5568_v50, %v5307_v14  ;;  %v2685_v60 = vrot.slane %v5593_v48, %v5305_v10 }
 0x269   : > { %v2413_v19 = vadd.f32 %v2412_v33, %v5279_v42  ;;  %v2466_v30 = vadd.f32 %v2465_v61, %v5279_v42  ;;  %v2693_v33 = vrot.slane %v5593_v48, %v5311_v16  ;;  %v2403_v41 = vadd.f32 %v5555_v35, %v5307_v14 }
 0x26a   : > { %v2414_v11 = vpop.f32.mrf.mxu0  ;;  %v2467_v31 = vpop.f32.mrf.mxu1  ;;  %v2705_v61 = vrot.slane %v5593_v48, %v5319_v21  ;;  %vm2738_vm15 = vcmp.eq.s32.totalorder %v5241_v26, %v2685_v60  ;;  %v2713_v16 = vrot.slane %v5593_v48, %v5322_v23 }
 0x26b   : > { %3539 = vmatpush1.xpose.msra.mxu0 %v2301_v13  ;;  %3609 = vmatpush1.xpose.msra.mxu1 %v2354_v29  ;;  %v2415_v59 = vadd.f32 %v2414_v11, %v5279_v42  ;;  %v2468_v18 = vadd.f32 %v2467_v31, %v5279_v42  ;;  %v2456_v13 = vadd.f32 %v5559_v56, %v5307_v14 }
 0x26c   : > { %3540 = vmatprep.subr.mxu0 %v2299_v5  ;;  %v2416_v12 = vpop.f32.mrf.mxu0  ;;  %3610 = vmatprep.subr.mxu1 %v2352_v52  ;;  %v2469_v22 = vpop.f32.mrf.mxu1  ;;  %vm2740_vm0 = vcmp.eq.s32.totalorder %v5241_v26, %v2693_v33  ;;  %vm2743_vm1 = vcmp.eq.s32.totalorder %v5241_v26, %v2705_v61  ;;  %vm2745_vm2 = vcmp.eq.s32.totalorder %v5241_v26, %v2713_v16 }
 0x26d   : > { %v2417_v4 = vadd.f32 %v2416_v12, %v5276_v36  ;;  %v2470_v1 = vadd.f32 %v2469_v22, %v5276_v36  ;;  %v2709_v22 = vrot.slane %v5593_v48, %v5368_v47 }
 0x26e   : > { %v2418_v24 = vpop.f32.mrf.mxu0  ;;  %v2471_v6 = vpop.f32.mrf.mxu1 }
 0x26f   : > { %v2419_v9 = vadd.f32 %v2418_v24, %v5276_v36  ;;  %3541 = vmatpush1.xpose.msra.mxu0 %v2297_v15  ;;  %v2472_v55 = vadd.f32 %v2471_v6, %v5276_v36  ;;  %3611 = vmatpush1.xpose.msra.mxu1 %v2350_v0  ;;  %v2701_v15 = vrot.slane %v5593_v48, %v5365_v45 }
 0x270   : > { %v5608_v7 = vpop.f32.mrf.mxu0  ;;  %v5612_v20 = vpop.f32.mrf.mxu1  ;;  %vm2744_vm5 = vcmp.eq.s32.totalorder %v5241_v26, %v2709_v22 }
 0x271   : > { %3674 = vmatprep.subr.mxu0 %v2419_v9  ;;  %3744 = vmatprep.subr.mxu1 %v2472_v55  ;;  %v2509_v0 = vadd.f32 %v5608_v7, %v5307_v14  ;;  %v2562_v24 = vadd.f32 %v5612_v20, %v5307_v14  ;;  %vm2742_vm4 = vcmp.eq.s32.totalorder %v5241_v26, %v2701_v15 }
 0x272   : > { %4245 = vmatmul.mubr.msk.f32.vlgmr.msra.gmra.mxu0 %vm2734_vm11, %v4570_v39  ;;  %v5617_v58 = vpop.f32.mrf.mxu0  ;;  %v5621_v44 = vpop.f32.mrf.mxu1  ;;  %4247 = vmatmul.mubr.msk.f32.vlgmr.msra.gmra.mxu1 %vm2736_vm12, %v4570_v39 }
 0x273   : > { %3675 = vmatpush1.xpose.msra.mxu0 %v2417_v4  ;;  %3745 = vmatpush1.xpose.msra.mxu1 %v2470_v1  ;;  %v2511_v12 = vadd.f32 %v5617_v58, %v5307_v14 }
 0x274   : > { %3676 = vmatprep.subr.mxu0 %v2415_v59  ;;  %v5625_v3 = vpop.f32.mrf.mxu0  ;;  %3746 = vmatprep.subr.mxu1 %v2468_v18  ;;  %v5628_v2 = vpop.f32.mrf.mxu1 }
 0x275   : > { %4248 = vmatprep.mubr.msk.f32.mxu0 %vm2739_vm13, %v4570_v39  ;;  %4250 = vmatprep.mubr.msk.f32.mxu1 %vm2741_vm14, %v4570_v39  ;;  %v2513_v27 = vadd.f32 %v5625_v3, %v5294_v53  ;;  %v2566_v32 = vadd.f32 %v5628_v2, %v5294_v53 }
 0x276   : > { %v2514_v34 = vpop.f32.mrf.mxu0  ;;  %v2567_v63 = vpop.f32.mrf.mxu1 }
 0x277   : > { %3677 = vmatpush1.xpose.msra.mxu0 %v2413_v19  ;;  %3747 = vmatpush1.xpose.msra.mxu1 %v2466_v30  ;;  %v2568_v31 = vadd.f32 %v2567_v63, %v5294_v53 }
 0x278   : > { %3678 = vmatprep.subr.mxu0 %v2409_v28  ;;  %v2518_v62 = vpop.f32.mrf.mxu0  ;;  %3748 = vmatprep.subr.mxu1 %v2462_v51  ;;  %v2571_v57 = vpop.f32.mrf.mxu1 }
 0x279   : > { %v2519_v23 = vadd.f32 %v2518_v62, %v5279_v42  ;;  %v2572_v52 = vadd.f32 %v2571_v57, %v5279_v42 }
 0x27a   : > { %v2520_v49 = vpop.f32.mrf.mxu0  ;;  %v2573_v40 = vpop.f32.mrf.mxu1 }
 0x27b   : > { %3679 = vmatpush1.xpose.msra.mxu0 %v2407_v8  ;;  %3749 = vmatpush1.xpose.msra.mxu1 %v2460_v17  ;;  %v2521_v29 = vadd.f32 %v2520_v49, %v5279_v42  ;;  %v2574_v11 = vadd.f32 %v2573_v40, %v5279_v42  ;;  %v2564_v42 = vadd.f32 %v5621_v44, %v5307_v14 }
 0x27c   : > { %3680 = vmatprep.subr.mxu0 %v2405_v46  ;;  %v2522_v43 = vpop.f32.mrf.mxu0  ;;  %3750 = vmatprep.subr.mxu1 %v2458_v25  ;;  %v2575_v54 = vpop.f32.mrf.mxu1 }
 0x27d   : > { %v2523_v56 = vadd.f32 %v2522_v43, %v5276_v36  ;;  %v2576_v21 = vadd.f32 %v2575_v54, %v5276_v36 }
 0x27e   : > { %v2524_v50 = vpop.f32.mrf.mxu0  ;;  %v2577_v5 = vpop.f32.mrf.mxu1 }
 0x27f   : > { %v2525_v10 = vadd.f32 %v2524_v50, %v5276_v36  ;;  %3681 = vmatpush1.xpose.msra.mxu0 %v2403_v41  ;;  %v2578_v35 = vadd.f32 %v2577_v5, %v5276_v36  ;;  %3751 = vmatpush1.xpose.msra.mxu1 %v2456_v13  ;;  %v2515_v36 = vadd.f32 %v2514_v34, %v5294_v53 }
 0x281   : > { %3814 = vmatprep.subr.mxu0 %v2525_v10  ;;  %3884 = vmatprep.subr.mxu1 %v2578_v35  ;;  %v3930_v10 = vld [vmem:[%s4772_s19] sm:$0xff] }
 0x282   : > { %4249 = vmatmul.mubr.msk.f32.vlgmr.msra.gmra.mxu0 %vm2738_vm15, %v4570_v39  ;;  %4251 = vmatmul.mubr.msk.f32.vlgmr.msra.gmra.mxu1 %vm2740_vm0, %v4570_v39 }
 0x283   : > { %3815 = vmatpush1.xpose.msra.mxu0 %v2523_v56  ;;  %3885 = vmatpush1.xpose.msra.mxu1 %v2576_v21 }
 0x284   : > { %3816 = vmatprep.subr.mxu0 %v2521_v29  ;;  %3886 = vmatprep.subr.mxu1 %v2574_v11 }
 0x285   : > { %4252 = vmatprep.mubr.msk.f32.mxu0 %vm2743_vm1, %v4570_v39  ;;  %4254 = vmatprep.mubr.msk.f32.mxu1 %vm2745_vm2, %v4570_v39 }
 0x287   : > { %3817 = vmatpush1.xpose.msra.mxu0 %v2519_v23  ;;  %3887 = vmatpush1.xpose.msra.mxu1 %v2572_v52 }
 0x288   : > { %3818 = vmatprep.subr.mxu0 %v2515_v36  ;;  %3888 = vmatprep.subr.mxu1 %v2568_v31 }
 0x28b   : > { %3819 = vmatpush1.xpose.msra.mxu0 %v2513_v27  ;;  %3889 = vmatpush1.xpose.msra.mxu1 %v2566_v32 }
 0x28c   : > { %3820 = vmatprep.subr.mxu0 %v2511_v12  ;;  %3890 = vmatprep.subr.mxu1 %v2564_v42 }
 0x28f   : > { %3821 = vmatpush1.xpose.msra.mxu0 %v2509_v0  ;;  %3891 = vmatpush1.xpose.msra.mxu1 %v2562_v24 }
 0x292   : > { %4253 = vmatmul.mubr.msk.f32.vlgmr.msra.gmra.mxu0 %vm2742_vm4, %v4570_v39  ;;  %4255 = vmatmul.mubr.msk.f32.vlgmr.msra.gmra.mxu1 %vm2744_vm5, %v4570_v39 }
 0x2e0   : > { %v2876_v53 = vpop.f32.mrf.mxu0 }
 0x2e2   : > { %v2878_v45 = vpop.f32.mrf.mxu0  ;;  %v2946_v47 = vpop.f32.mrf.mxu1 }
 0x2e3   : > { %v2947_v48 = vadd.f32 %v2946_v47, %v2876_v53 }
 0x2e4   : > { %v2948_v37 = vpop.f32.mrf.mxu1 }
 0x2f1   : > { %v3016_v9 = vpop.f32.mrf.mxu0 }
 0x2f2   : > { %v3017_v6 = vadd.f32 %v3016_v9, %v2947_v48  ;;  %v3086_v38 = vpop.f32.mrf.mxu1 }
 0x2f3   : > { %v3018_v55 = vpop.f32.mrf.mxu0 }
 0x2f4   : > { %v3087_v14 = vadd.f32 %v3086_v38, %v3017_v6  ;;  %v3088_v7 = vpop.f32.mrf.mxu1 }
 0x302   : > { %v3156_v4 = vpop.f32.mrf.mxu0  ;;  %v3226_v20 = vpop.f32.mrf.mxu1 }
 0x303   : > { %v3157_v51 = vadd.f32 %v3156_v4, %v3087_v14 }
 0x304   : > { %v3158_v59 = vpop.f32.mrf.mxu0  ;;  %v3228_v1 = vpop.f32.mrf.mxu1 }
 0x305   : > { %v3227_v62 = vadd.f32 %v3226_v20, %v3157_v51 }
 0x312   : > { %v3296_v26 = vpop.f32.mrf.mxu0  ;;  %v3366_v58 = vpop.f32.mrf.mxu1 }
 0x313   : > { %v3297_v8 = vadd.f32 %v3296_v26, %v3227_v62 }
 0x314   : > { %v3298_v18 = vpop.f32.mrf.mxu0  ;;  %v3368_v44 = vpop.f32.mrf.mxu1 }
 0x315   : > { %v3367_v57 = vadd.f32 %v3366_v58, %v3297_v8 }
 0x322   : > { %v3436_v39 = vpop.f32.mrf.mxu0  ;;  %v3506_v3 = vpop.f32.mrf.mxu1 }
 0x323   : > { %v3437_v46 = vadd.f32 %v3436_v39, %v3367_v57 }
 0x324   : > { %v3438_v19 = vpop.f32.mrf.mxu0  ;;  %v3508_v2 = vpop.f32.mrf.mxu1 }
 0x325   : > { %v3507_v40 = vadd.f32 %v3506_v3, %v3437_v46 }
 0x332   : > { %v3576_v28 = vpop.f32.mrf.mxu0  ;;  %v3646_v30 = vpop.f32.mrf.mxu1 }
 0x333   : > { %v3577_v43 = vadd.f32 %v3576_v28, %v3507_v40 }
 0x334   : > { %v3578_v34 = vpop.f32.mrf.mxu0  ;;  %v3648_v63 = vpop.f32.mrf.mxu1 }
 0x335   : > { %v3647_v33 = vadd.f32 %v3646_v30, %v3577_v43 }
 0x342   : > { %v3716_v17 = vpop.f32.mrf.mxu0  ;;  %v3786_v49 = vpop.f32.mrf.mxu1 }
 0x343   : > { %v3717_v41 = vadd.f32 %v3716_v17, %v3647_v33 }
 0x344   : > { %v3718_v25 = vpop.f32.mrf.mxu0  ;;  %v3788_v60 = vpop.f32.mrf.mxu1 }
 0x345   : > { %v3787_v54 = vadd.f32 %v3786_v49, %v3717_v41 }
 0x352   : > { %v3856_v13 = vpop.f32.mrf.mxu0  ;;  %v3926_v61 = vpop.f32.mrf.mxu1 }
 0x353   : > { %v3857_v50 = vadd.f32 %v3856_v13, %v3787_v54 }
 0x354   : > { %v3858_v5 = vpop.f32.mrf.mxu0  ;;  %v3928_v35 = vpop.f32.mrf.mxu1 }
 0x355   : > { %v3927_v16 = vadd.f32 %v3926_v61, %v3857_v50 }
 0x357   : > { %v3931_v56 = vadd.f32 %v3930_v10, %v3927_v16 }
 0x359   : > { %3932 = vst.msk [vmem:[%s4772_s19] sm:$0xff] %vm1725_vm3, %v3931_v56 }
 0x35a   : > { %4450 = shalt.err (!%p4447_p5)
}
 0x35b   : > { %s4451_s17 = scalar_lea.hbm %s3945_s13, 128  ;;  %s4455_s26 = scalar_lea.hbm %s5790_s10, 256 }
 0x35c   : > { %p4452_p4 = scmp.ne.s32.totalorder %s3945_s13, %s4451_s17  ;;  %p4456_p0 = scmp.lt.s32.totalorder %s3945_s13, %s5790_s10 }
 0x35d   : > { %p4457_p3 = scmp.lt.s32.totalorder %s4455_s26, %s4451_s17 }
 0x35e   : > { %p4453_p11 = pnand %p4452_p4, %p4700_p12 }
 0x35f   : > { %p4458_p7 = por %p4457_p3, %p4456_p0 }
 0x360   : > { %p4454_p13 = pneg %p4453_p11 }
 0x362   : > { %p4459_p6 = pnand %p4458_p7, %p4454_p13 }
 0x364   : > { %4462 = shalt.err (!%p4459_p6)
}
 0x365   : > { %4266 = dma.vmem_to_hbm [thread:$0]  (%p4700_p12), %s3948_s11, 128, %s3945_s13, %s3934_s0  }
 0x366 PF: > { %s5791_s14 = sld [smem:[#allocation11_spill]]  ;;  %p4280_p1 = scmp.ge.s32.totalorder %s4561_s7, 2 }
 0x368   : > { %p4276_p8 = pnand %p4280_p1, %p4712_p2 }
 0x36a   : > { %p4277_p9 = pneg %p4276_p8 }
 0x36c   : > { %s3959_s20 = sand.u32 1, %s5791_s14  }
 0x36d   : > { %s3960_s8 = scalar_lea.sflag [#allocation4], %s3959_s20 }
 0x36e   : > { %4516 = dma.done.wait (%p4277_p9), %s3960_s8, 128  }
 0x36f   : > { %4518 = vsyncadd (%p4277_p9), %s3960_s8, 4294967168  ;;  %s25_s7 = sadd.s32 1, %s4561_s7   ;;  %s5793_s9 = sld [smem:[#allocation12_spill]] }
 0x370   : > { %p22_p10 = scmp.ge.s32.totalorder %s25_s7, 6   ;;  %s5794_s23 = sld [smem:[#allocation18_spill]] }
 0x371   : > { %s5795_s29 = sld [smem:[#allocation13_spill]]  ;;  %s5801_s21 = smov %s4525_s22 }
 0x372   : > { %s5796_s26 = sld [smem:[#allocation19_spill]]  ;;  %s5803_s24 = smov %s4537_s25 }
 0x373   : > { %s5797_s27 = sld [smem:[#allocation14_spill]] }
 0x374   : > { %s5798_s28 = sld [smem:[#allocation15_spill]] }
 0x375   : > { %s5799_s6 = sld [smem:[#allocation16_spill]]  ;;  %s5802_s22 = smov %s5793_s9 }
 0x376   : > { %s5800_s30 = sld [smem:[#allocation17_spill]] }
 0x377   : > { %s5804_s25 = smov %s5795_s29  ;;  %24 = sbr.rel (!%p22_p10) target bundleno = 14 (0xe), region = 106 }
 0x37b   : > { %s5805_s29 = smov %s5799_s6 }
 0x37c   :  { %3965 = vsyncpa [#allocation3], 1 }
 0x37d   :  { %3967 = vsyncpa [#allocation3 + $0x1], 1 }
 0x37e   :  { %3968 = vsyncpa [#allocation6], 1 }
 0x37f   :  { %3970 = vsyncpa [#allocation6 + $0x1], 1 }
 0x380   :  { %3971 = vsyncpa [#allocation4], 1 }
 0x381   :  { %3973 = vsyncpa [#allocation4 + $0x1], 1 }

</bundles_post_ra>
